<compile_context>
chip_gen: v7x
topology: tpu7x:2x2x1
jax: 0.10.0
libtpu: 0.0.40
codegen_flags: <defaults>
</compile_context>

<pallas_src>
import functools

import jax
import jax.numpy as jnp
from jax.experimental import pallas as pl
from jax.experimental.pallas import tpu as pltpu

_H0 = 1024
_H1 = 512
_LN_EPS = 1e-5


def _softplus(z):
    # Numerically stable log(1 + exp(z)) built from EUP-native exp/log.
    return jnp.maximum(z, 0.0) + jnp.log(1.0 + jnp.exp(-jnp.abs(z)))


def mi_kernel(x_ref, w0_ref, b0_ref, w1_hbm_ref, b1_ref, w2_ref, b2_ref,
              out_ref, w1_vmem, w1_sem, *, batch, visual_size):
    # Kick off the dominant DMA (w1, ~1 MiB) immediately so it overlaps with
    # the LayerNorm + layer-0 work below; wait only right before layer 1.
    w1_copy = pltpu.make_async_copy(w1_hbm_ref, w1_vmem, w1_sem)
    w1_copy.start()

    x = x_ref[...]                                            # (2B, Vs+Ls) f32
    lane = jax.lax.broadcasted_iota(jnp.int32, x.shape, 1)
    vis_lanes = lane < visual_size

    # LayerNorm over the visual lanes only (per-row stats over the first Vs
    # lanes); language lanes pass through untouched.
    vis = x[:, :visual_size]
    mu = jnp.mean(vis, axis=-1, keepdims=True)
    var = jnp.mean((vis - mu) ** 2, axis=-1, keepdims=True)
    rsig = jax.lax.rsqrt(var + _LN_EPS)
    lhs = jnp.where(vis_lanes, (x - mu) * rsig, x).astype(jnp.bfloat16)

    # Layer 0: a single K=(Vs+Ls) MXU pass over the stacked real/fake batch.
    h0 = jnp.dot(lhs, w0_ref[...], preferred_element_type=jnp.float32)
    h0 = jnp.maximum(h0 + b0_ref[...], 0.0)

    # Layer 1: the w1 HBM fetch has been running behind the work above.
    w1_copy.wait()
    h1 = jnp.dot(h0.astype(jnp.bfloat16), w1_vmem[...],
                 preferred_element_type=jnp.float32)
    h1 = jnp.maximum(h1 + b1_ref[...], 0.0)

    # Layer 2 (512 -> 1): VPU multiply + lane reduce (no N=1 MXU matmul).
    d = jnp.sum(h1 * w2_ref[...], axis=-1, keepdims=True) + b2_ref[...]  # (2B,1)

    # Ej - Em = -(1/B) * [ sum_{i<B} softplus(-d_i) + sum_{i>=B} softplus(d_i) ]
    row = jax.lax.broadcasted_iota(jnp.int32, d.shape, 0)
    sign = jnp.where(row < batch, -1.0, 1.0)
    sp = _softplus(sign * d)
    out_ref[...] = -jnp.sum(sp, axis=0, keepdims=True) * (1.0 / batch)


def mi_forward(visual, language, params):
    """MI.forward(visual, language) -> scalar f32 (Pallas TPU kernel)."""
    b, vs = visual.shape
    ls = language.shape[-1]
    w0, b0, w1, b1, w2_row, b2 = params

    # Fake visual batch = rows rolled by one, exactly torch.cat((v[1:], v[:1])).
    # LayerNorm is per-row so it commutes with the row permutation; the roll and
    # the feature concat are pure layout plumbing done in XLA, while all the
    # math runs inside the kernel on the stacked (2B, Vs+Ls) batch.
    visual_fake = jnp.concatenate([visual[1:], visual[:1]], axis=0)
    x_stack = jnp.concatenate(
        [jnp.concatenate([visual, language], axis=-1),
         jnp.concatenate([visual_fake, language], axis=-1)], axis=0)

    vmem = pl.BlockSpec(memory_space=pltpu.MemorySpace.VMEM)
    hbm = pl.BlockSpec(memory_space=pl.ANY)      # w1: fetched manually in-kernel

    flops = (2 * (2 * b) * (vs + ls) * _H0       # layer 0
             + 2 * (2 * b) * _H0 * _H1           # layer 1
             + 2 * (2 * b) * _H1)                # 512 -> 1 reduce
    bytes_accessed = (((vs + ls) * _H0 + _H0 * _H1) * 2        # bf16 weights
                      + (_H0 + _H1 + _H1 + 1) * 4              # biases + w2 row
                      + 2 * b * (vs + ls) * 4 + 4)             # activations + out
    cost = pl.CostEstimate(flops=flops, transcendentals=6 * b,
                           bytes_accessed=bytes_accessed)

    out = pl.pallas_call(
        functools.partial(mi_kernel, batch=b, visual_size=vs),
        out_shape=jax.ShapeDtypeStruct((1, 1), jnp.float32),
        in_specs=[vmem, vmem, vmem, hbm, vmem, vmem, vmem],
        out_specs=pl.BlockSpec(memory_space=pltpu.MemorySpace.VMEM),
        scratch_shapes=[pltpu.VMEM((_H0, _H1), jnp.bfloat16),
                        pltpu.SemaphoreType.DMA(())],
        cost_estimate=cost,
    )(x_stack, w0, b0, w1, b1, w2_row, b2)
    return out[0, 0]


def init_params(key, visual_size, language_size):
    """f32 master params mirroring nn.Linear default init U[-1/sqrt(fan_in), ..]."""
    in_feature = visual_size + language_size
    ks = jax.random.split(key, 6)

    def lin(kw, kb, fan_in, fan_out):
        lim = 1.0 / jnp.sqrt(fan_in)
        w = jax.random.uniform(kw, (fan_in, fan_out), jnp.float32, -lim, lim)
        bias = jax.random.uniform(kb, (1, fan_out), jnp.float32, -lim, lim)
        return w, bias

    w0, b0 = lin(ks[0], ks[1], in_feature, _H0)
    w1, b1 = lin(ks[2], ks[3], _H0, _H1)
    w2, b2 = lin(ks[4], ks[5], _H1, 1)
    return {"w0": w0, "b0": b0, "w1": w1, "b1": b1, "w2": w2, "b2": b2}


def pack_kernel_params(p):
    """Kernel-side params: bf16 matmul weights (MXU-native, halves weight DMA),
    f32 biases, and the 512->1 layer as a (1, 512) f32 row for the VPU reduce."""
    # TODO(synk): int8 (v5e/v6e) / fp8 (v7x) weight storage with per-channel
    # scales would halve the dominant weight DMA; gate on pltpu.get_tpu_info().
    return (p["w0"].astype(jnp.bfloat16), p["b0"],
            p["w1"].astype(jnp.bfloat16), p["b1"],
            p["w2"].T, p["b2"])


def mi_reference(visual, language, p):
    """Pure-JAX f32 reference of MI.forward, used for a tolerance check."""
    mu = jnp.mean(visual, axis=-1, keepdims=True)
    var = jnp.mean((visual - mu) ** 2, axis=-1, keepdims=True)
    v_ln = (visual - mu) / jnp.sqrt(var + _LN_EPS)
    v_fake = jnp.concatenate([v_ln[1:], v_ln[:1]], axis=0)

    def disc(v):
        x = jnp.concatenate([v, language], axis=-1)
        h = jax.nn.relu(x @ p["w0"] + p["b0"])
        h = jax.nn.relu(h @ p["w1"] + p["b1"])
        return h @ p["w2"] + p["b2"]

    ej = jnp.mean(-jax.nn.softplus(-disc(v_ln)))
    em = jnp.mean(jax.nn.softplus(disc(v_fake)))
    return ej - em


if __name__ == "__main__":
    B, VISUAL, LANG = 8, 32, 32

    key = jax.random.PRNGKey(0)
    k_param, k_vis, k_lang = jax.random.split(key, 3)

    master = init_params(k_param, VISUAL, LANG)
    kernel_params = pack_kernel_params(master)
    visual = jax.random.normal(k_vis, (B, VISUAL), jnp.float32)
    language = jax.random.normal(k_lang, (B, LANG), jnp.float32)

    out = jax.block_until_ready(mi_forward(visual, language, kernel_params))
    ref = jax.block_until_ready(mi_reference(visual, language, master))

    # bf16 weights/activations vs the f32 reference: expected |diff| ~1e-3.
    if (not bool(jnp.isfinite(out))) or abs(float(out) - float(ref)) > 5e-2:
        raise SystemExit(f"MISMATCH: kernel={float(out)!r} ref={float(ref)!r}")
    print("KERNEL_OK")
</pallas_src>

<mosaic_0001>
module attributes {stable_mosaic.version = 11 : i64} {
  func.func @mi_kernel(%arg0: memref<16x64xf32, #tpu.memory_space<vmem>>, %arg1: memref<64x1024xbf16, #tpu.memory_space<vmem>>, %arg2: memref<1x1024xf32, #tpu.memory_space<vmem>>, %arg3: memref<1024x512xbf16, #tpu.memory_space<any>>, %arg4: memref<1x512xf32, #tpu.memory_space<vmem>>, %arg5: memref<1x512xf32, #tpu.memory_space<vmem>>, %arg6: memref<1x1xf32, #tpu.memory_space<vmem>>, %arg7: memref<1x1xf32, #tpu.memory_space<vmem>>, %arg8: memref<1024x512xbf16, #tpu.memory_space<vmem>>, %arg9: memref<!tpu.dma_semaphore, #tpu.memory_space<semaphore_mem>>) attributes {dimension_semantics = [], scalar_prefetch = 0 : i64, scratch_operands = 2 : i64, tpu.core_type = #tpu.core_type<tc>} {
    tpu.enqueue_dma source(%arg3 : memref<1024x512xbf16, #tpu.memory_space<any>>) target(%arg8 : memref<1024x512xbf16, #tpu.memory_space<vmem>>) target_semaphore(%arg9 : memref<!tpu.dma_semaphore, #tpu.memory_space<semaphore_mem>>)
    %c0 = arith.constant 0 : index
    %c0_0 = arith.constant 0 : index
    %0 = vector.load %arg0[%c0, %c0_0] : memref<16x64xf32, #tpu.memory_space<vmem>>, vector<16x64xf32>
    %1 = tpu.iota {dimensions = array<i32: 1>} : vector<16x64xi32>
    %c32_i32 = arith.constant 32 : i32
    %2 = vector.broadcast %c32_i32 : i32 to vector<16x64xi32>
    %3 = arith.cmpi slt, %1, %2 : vector<16x64xi32>
    %4 = vector.extract_strided_slice %0 {offsets = [0, 0], sizes = [16, 32], strides = [1, 1]} : vector<16x64xf32> to vector<16x32xf32>
    %cst = arith.constant dense<0.000000e+00> : vector<16xf32>
    %5 = vector.multi_reduction <add>, %4, %cst [1] : vector<16x32xf32> to vector<16xf32>
    %6 = vector.shape_cast %5 : vector<16xf32> to vector<16x1xf32>
    %cst_1 = arith.constant 3.200000e+01 : f32
    %7 = vector.broadcast %cst_1 : f32 to vector<16x1xf32>
    %8 = arith.divf %6, %7 : vector<16x1xf32>
    %9 = vector.broadcast %8 : vector<16x1xf32> to vector<16x32xf32>
    %10 = arith.subf %4, %9 : vector<16x32xf32>
    %11 = arith.mulf %10, %10 : vector<16x32xf32>
    %cst_2 = arith.constant dense<0.000000e+00> : vector<16xf32>
    %12 = vector.multi_reduction <add>, %11, %cst_2 [1] : vector<16x32xf32> to vector<16xf32>
    %13 = vector.shape_cast %12 : vector<16xf32> to vector<16x1xf32>
    %cst_3 = arith.constant 3.200000e+01 : f32
    %14 = vector.broadcast %cst_3 : f32 to vector<16x1xf32>
    %15 = arith.divf %13, %14 : vector<16x1xf32>
    %cst_4 = arith.constant 9.99999974E-6 : f32
    %16 = vector.broadcast %cst_4 : f32 to vector<16x1xf32>
    %17 = arith.addf %15, %16 : vector<16x1xf32>
    %18 = math.rsqrt %17 : vector<16x1xf32>
    %19 = vector.broadcast %8 : vector<16x1xf32> to vector<16x64xf32>
    %20 = arith.subf %0, %19 : vector<16x64xf32>
    %21 = vector.broadcast %18 : vector<16x1xf32> to vector<16x64xf32>
    %22 = arith.mulf %20, %21 : vector<16x64xf32>
    %23 = arith.select %3, %22, %0 : vector<16x64xi1>, vector<16x64xf32>
    %24 = arith.truncf %23 : vector<16x64xf32> to vector<16x64xbf16>
    %c0_5 = arith.constant 0 : index
    %c0_6 = arith.constant 0 : index
    %25 = vector.load %arg1[%c0_5, %c0_6] : memref<64x1024xbf16, #tpu.memory_space<vmem>>, vector<64x1024xbf16>
    %cst_7 = arith.constant dense<0.000000e+00> : vector<16x1024xf32>
    %26 = tpu.matmul %24, %25, %cst_7 {dimension_numbers = #tpu.dot_dimension_numbers<[1], [0], [0], [1], [0, 0, 1, 1], [], []>} : vector<16x64xbf16>, vector<64x1024xbf16>, vector<16x1024xf32> -> vector<16x1024xf32>
    %c0_8 = arith.constant 0 : index
    %c0_9 = arith.constant 0 : index
    %27 = vector.load %arg2[%c0_8, %c0_9] : memref<1x1024xf32, #tpu.memory_space<vmem>>, vector<1x1024xf32>
    %28 = vector.broadcast %27 : vector<1x1024xf32> to vector<16x1024xf32>
    %29 = arith.addf %26, %28 : vector<16x1024xf32>
    %cst_10 = arith.constant 0.000000e+00 : f32
    %30 = vector.broadcast %cst_10 : f32 to vector<16x1024xf32>
    %31 = arith.maximumf %29, %30 : vector<16x1024xf32>
    tpu.wait_dma2 semaphore(%arg9 : memref<!tpu.dma_semaphore, #tpu.memory_space<semaphore_mem>>) src(%arg3 : memref<1024x512xbf16, #tpu.memory_space<any>>) dst(%arg8 : memref<1024x512xbf16, #tpu.memory_space<vmem>>)
    %32 = arith.truncf %31 : vector<16x1024xf32> to vector<16x1024xbf16>
    %c0_11 = arith.constant 0 : index
    %c0_12 = arith.constant 0 : index
    %33 = vector.load %arg8[%c0_11, %c0_12] : memref<1024x512xbf16, #tpu.memory_space<vmem>>, vector<1024x512xbf16>
    %cst_13 = arith.constant dense<0.000000e+00> : vector<16x512xf32>
    %34 = tpu.matmul %32, %33, %cst_13 {dimension_numbers = #tpu.dot_dimension_numbers<[1], [0], [0], [1], [0, 0, 1, 1], [], []>} : vector<16x1024xbf16>, vector<1024x512xbf16>, vector<16x512xf32> -> vector<16x512xf32>
    %c0_14 = arith.constant 0 : index
    %c0_15 = arith.constant 0 : index
    %35 = vector.load %arg4[%c0_14, %c0_15] : memref<1x512xf32, #tpu.memory_space<vmem>>, vector<1x512xf32>
    %36 = vector.broadcast %35 : vector<1x512xf32> to vector<16x512xf32>
    %37 = arith.addf %34, %36 : vector<16x512xf32>
    %cst_16 = arith.constant 0.000000e+00 : f32
    %38 = vector.broadcast %cst_16 : f32 to vector<16x512xf32>
    %39 = arith.maximumf %37, %38 : vector<16x512xf32>
    %c0_17 = arith.constant 0 : index
    %c0_18 = arith.constant 0 : index
    %40 = vector.load %arg5[%c0_17, %c0_18] : memref<1x512xf32, #tpu.memory_space<vmem>>, vector<1x512xf32>
    %41 = vector.broadcast %40 : vector<1x512xf32> to vector<16x512xf32>
    %42 = arith.mulf %39, %41 : vector<16x512xf32>
    %cst_19 = arith.constant dense<0.000000e+00> : vector<16xf32>
    %43 = vector.multi_reduction <add>, %42, %cst_19 [1] : vector<16x512xf32> to vector<16xf32>
    %44 = vector.shape_cast %43 : vector<16xf32> to vector<16x1xf32>
    %c0_20 = arith.constant 0 : index
    %c0_21 = arith.constant 0 : index
    %45 = vector.load %arg6[%c0_20, %c0_21] : memref<1x1xf32, #tpu.memory_space<vmem>>, vector<1x1xf32>
    %46 = vector.broadcast %45 : vector<1x1xf32> to vector<16x1xf32>
    %47 = arith.addf %44, %46 : vector<16x1xf32>
    %48 = tpu.iota {dimensions = array<i32: 0>} : vector<16x1xi32>
    %c8_i32 = arith.constant 8 : i32
    %49 = vector.broadcast %c8_i32 : i32 to vector<16x1xi32>
    %50 = arith.cmpi slt, %48, %49 : vector<16x1xi32>
    %cst_22 = arith.constant -1.000000e+00 : f32
    %cst_23 = arith.constant 1.000000e+00 : f32
    %51 = vector.broadcast %cst_22 : f32 to vector<16x1xf32>
    %52 = vector.broadcast %cst_23 : f32 to vector<16x1xf32>
    %53 = arith.select %50, %51, %52 : vector<16x1xi1>, vector<16x1xf32>
    %54 = arith.mulf %53, %47 : vector<16x1xf32>
    %cst_24 = arith.constant 0.000000e+00 : f32
    %55 = vector.broadcast %cst_24 : f32 to vector<16x1xf32>
    %56 = arith.maximumf %54, %55 : vector<16x1xf32>
    %57 = math.absf %54 : vector<16x1xf32>
    %cst_25 = arith.constant 0.000000e+00 : f32
    %58 = vector.broadcast %cst_25 : f32 to vector<16x1xf32>
    %59 = arith.subf %58, %57 : vector<16x1xf32>
    %60 = math.exp %59 : vector<16x1xf32>
    %cst_26 = arith.constant 1.000000e+00 : f32
    %61 = vector.broadcast %cst_26 : f32 to vector<16x1xf32>
    %62 = arith.addf %61, %60 : vector<16x1xf32>
    %63 = math.log %62 : vector<16x1xf32>
    %64 = arith.addf %56, %63 : vector<16x1xf32>
    %cst_27 = arith.constant dense<0.000000e+00> : vector<1xf32>
    %65 = vector.multi_reduction <add>, %64, %cst_27 [0] : vector<16x1xf32> to vector<1xf32>
    %66 = vector.shape_cast %65 : vector<1xf32> to vector<1x1xf32>
    %cst_28 = arith.constant 0.000000e+00 : f32
    %67 = vector.broadcast %cst_28 : f32 to vector<1x1xf32>
    %68 = arith.subf %67, %66 : vector<1x1xf32>
    %cst_29 = arith.constant 1.250000e-01 : f32
    %69 = vector.broadcast %cst_29 : f32 to vector<1x1xf32>
    %70 = arith.mulf %68, %69 : vector<1x1xf32>
    %c0_30 = arith.constant 0 : index
    %c0_31 = arith.constant 0 : index
    %71 = vector.load %arg7[%c0_30, %c0_31] : memref<1x1xf32, #tpu.memory_space<vmem>>, vector<1x1xf32>
    tpu.vector_store %arg7[%c0_30, %c0_31], %70 {strides = array<i32>} : memref<1x1xf32, #tpu.memory_space<vmem>>, vector<1x1xf32>,
    return
  }
}

</mosaic_0001>

<bundles_post_ra>
// kernel: tpu_custom_call.1
= control target key start
LH: loop header
LB: loop body
LE: loop exit
PB: predicated region body
PF: predicated region fallthrough
CT: control target
= control target key end

     0   :  { %s1707_s0 = inlined_call_operand.hbm [shape: f32[16,64], index: 0, kind: input, shape index: {}]   ;;  %s1708_s1 = inlined_call_operand.hbm [shape: bf16[64,1024], index: 1, kind: input, shape index: {}]   ;;  %s1709_s2 = inlined_call_operand.vmem [shape: f32[1,1024], index: 2, kind: input, shape index: {}]   ;;  %s1710_s3 = inlined_call_operand.hbm [shape: bf16[1024,512], index: 3, kind: input, shape index: {}]   ;;  %s1711_s4 = inlined_call_operand.vmem [shape: f32[1,512], index: 4, kind: input, shape index: {}]   ;;  %s1712_s5 = inlined_call_operand.vmem [shape: f32[1,512], index: 5, kind: input, shape index: {}]   ;;  %s1713_s6 = inlined_call_operand.<no memory space> [shape: f32[1,1], index: 6, kind: input, shape index: {}]   ;;  %s1714_s7 = inlined_call_operand.hbm [shape: f32[1,1], index: 7, kind: output, shape index: {}]  }
   0x1   :  { %v12_v0 = vstv %s1713_s6 }
   0x2   :  { %13 = vst [vmem:[#allocation4] sm:$0x1] %v12_v0 }
   0x3   :  { %14 = vsyncpa [#allocation6], 0 }
   0x4   :  { %15 = vsyncpa [#allocation9], 0 }
   0x5   :  { %16 = vsyncpa [#allocation7], 0  ;;  %s1480_s26 = smov [#allocation5]   ;;  %s1406_s30 = scalar_lea.hbm %s1707_s0, 256 }
   0x6   :  { %s22_s27 = sshll.u32 %s1480_s26, 4  ;;  %p1407_p0 = scmp.ne.s32.totalorder %s1707_s0, %s1406_s30  ;;  %s23_s27 = int_to_ptr.vmem [resolvable:$true] %s22_s27 }
   0x7   :  { %p1410_p1 = scmp.lt.u32.totalorder %s1406_s30, %s1707_s0 }
   0x9   :  { %p1412_p2 = pnand %p1410_p1, %p1407_p0 }
   0xb   :  { %1415 = shalt.err (!%p1412_p2)
}
   0xc   :  { %s1416_s6 = scalar_lea.vmem %s23_s27, 256  ;;  %p1421_p4 = scmp.lt.s32.totalorder %s23_s27, %s23_s27 }
   0xd   :  { %p1417_p3 = scmp.ne.s32.totalorder %s23_s27, %s1416_s6  ;;  %p1422_p5 = scmp.lt.s32.totalorder %s1416_s6, %s1416_s6 }
   0xf   :  { %p1423_p6 = por %p1422_p5, %p1421_p4 }
  0x11   :  { %p1424_p7 = pnand %p1423_p6, %p1417_p3 }
  0x13   :  { %1427 = shalt.err (!%p1424_p7)
}
  0x14   :  { %s1481_s12 = smov 128   ;;  %s1482_s13 = smov 8  }
  0x15   :  { %28 = dma.hbm_to_vmem [thread:$0]  %s1707_s0, 256, %s23_s27, [#allocation6], %s1481_s12, %s1481_s12, %s1482_s13  }
  0x16   :  { %s1483_s16 = smov [#allocation8]   ;;  %s1428_s20 = scalar_lea.hbm %s1708_s1, 4096 }
  0x17   :  { %s34_s17 = sshll.u32 %s1483_s16, 4  ;;  %p1429_p8 = scmp.ne.s32.totalorder %s1708_s1, %s1428_s20  ;;  %s35_s17 = int_to_ptr.vmem [resolvable:$true] %s34_s17 }
  0x18   :  { %p1432_p9 = scmp.lt.u32.totalorder %s1428_s20, %s1708_s1 }
  0x1a   :  { %p1434_p10 = pnand %p1432_p9, %p1429_p8 }
  0x1c   :  { %1437 = shalt.err (!%p1434_p10)
}
  0x1d   :  { %s1438_s25 = scalar_lea.vmem %s35_s17, 4096  ;;  %p1443_p12 = scmp.lt.s32.totalorder %s35_s17, %s35_s17 }
  0x1e   :  { %p1439_p11 = scmp.ne.s32.totalorder %s35_s17, %s1438_s25  ;;  %p1444_p13 = scmp.lt.s32.totalorder %s1438_s25, %s1438_s25 }
  0x20   :  { %p1445_p0 = por %p1444_p13, %p1443_p12 }
  0x22   :  { %p1446_p1 = pnand %p1445_p0, %p1439_p11 }
  0x24   :  { %1449 = shalt.err (!%p1446_p1)
}
  0x25   :  { %s1484_s0 = smov 512   ;;  %s1485_s26 = smov 32  }
  0x26   :  { %40 = dma.hbm_to_vmem [thread:$0]  %s1708_s1, 4096, %s35_s17, [#allocation9], %s1484_s0, %s1484_s0, %s1485_s26  }
  0x27   :  { %1472 = dma.done.wait [#allocation6], 256  }
  0x28   :  { %1473 = vsyncadd [#allocation6], 4294967040 }
  0x29   :  { %1474 = dma.done.wait [#allocation9], 4096  }
  0x2a   :  { %1475 = vsyncadd [#allocation9], 4294963200  ;;  %s60_s29 = sld [smem:[#allocation0]]   ;;  %72 = sst [smem:[#allocation12]] %s1484_s0  ;;  %vm96_vm0 = vcmask 261120   ;;  %v1493_v53 = vmov 0   ;;  %v93_v62 = vlaneseq }
  0x2b   :  { %74 = sst [smem:[#allocation12 + $0x1]] %s1484_s0  ;;  %s1486_s30 = smov 4   ;;  %397 = vmatprep.mubr.bf16.mxu0 %v1493_v53  ;;  %440 = vmatprep.mubr.bf16.mxu1 %v1493_v53  ;;  %vm361_vm2 = vcmask 523264  }
  0x2c   :  { %76 = sst [smem:[#allocation12 + $0x2]] %s1486_s30  ;;  %s1487_s8 = smov 64   ;;  %v94_v0 = vand.u32 127, %v93_v62 }
  0x2d   :  { %78 = sst [smem:[#allocation12 + $0x3]] %s1487_s8  ;;  %s1488_s9 = smov [#allocation2]  }
  0x2e   :  { %80 = sst [smem:[#allocation12 + $0x4]] %s1481_s12  ;;  %s68_s10 = sshll.u32 %s1488_s9, 4  ;;  %vm95_vm1 = vcmp.lt.s32.totalorder %v94_v0, 32  ;;  %s69_s10 = int_to_ptr.vmem [resolvable:$true] %s68_s10 }
  0x2f   :  { %s1489_s11 = smov 2   ;;  %s1490_s1 = smov 256  }
  0x30   :  { %82 = sst [smem:[#allocation12 + $0x5]] %s1489_s11  ;;  %s1307_s6 = sshll.u32 %s60_s29, 26 }
  0x31   :  { %84 = sst [smem:[#allocation12 + $0x6]] %s1490_s1  ;;  %s1308_s13 = sadd.s32 134217728, %s1307_s6 }
  0x32   :  { %86 = sst [smem:[#allocation12 + $0x7]] %s1487_s8  ;;  %s1491_s14 = smov [#allocation3]  }
  0x33   :  { %88 = sst [smem:[#allocation12 + $0x8]] %s1486_s30  ;;  %s1492_s15 = smov [#allocation11]  }
  0x34   :  { %90 = dma.general %s1710_s3, 32768, %s69_s10, %s1491_s14, %s1492_s15, [#allocation12], %s1308_s13, 0  }
  0x35   :  { %v1568_v1 = vld [vmem:[#allocation5] sm:$0xff]  ;;  %v1570_v2 = vld [vmem:[#allocation5 + $0x8] sm:$0xff]  ;;  %v127_v15 = vld [vmem:[#allocation8] sm:$0xff] }
  0x36   :  { %v97_v3 = vsel %vm96_vm0, %v1568_v1, 0.0  ;;  %v100_v4 = vsel %vm96_vm0, %v1570_v2, 0.0  ;;  %v131_v16 = vld [vmem:[#allocation8 + $0x20] sm:$0xff]  ;;  %v128_v17 = vld [vmem:[#allocation8 + $0x8] sm:$0xff]  ;;  %v129_v47 = vld [vmem:[#allocation8 + $0x10] sm:$0xff] }
  0x37   :  { %98 = vadd.xlane.f32.xlu0 %v97_v3  ;;  %v1310_v18 = vcombine.high %v127_v15, %v131_v16  ;;  %v132_v19 = vld [vmem:[#allocation8 + $0x28] sm:$0xff]  ;;  %v1309_v21 = vcombine.low %v127_v15, %v131_v16  ;;  %v135_v23 = vld [vmem:[#allocation8 + $0x40] sm:$0xff]  ;;  %v133_v48 = vld [vmem:[#allocation8 + $0x30] sm:$0xff] }
  0x38   :  { %v1312_v20 = vcombine.high %v128_v17, %v132_v19  ;;  %v1311_v22 = vcombine.low %v128_v17, %v132_v19  ;;  %v139_v24 = vld [vmem:[#allocation8 + $0x60] sm:$0xff]  ;;  %v136_v25 = vld [vmem:[#allocation8 + $0x48] sm:$0xff]  ;;  %v130_v49 = vld [vmem:[#allocation8 + $0x18] sm:$0xff]  ;;  %v1313_v50 = vcombine.low %v129_v47, %v133_v48  ;;  %v1314_v51 = vcombine.high %v129_v47, %v133_v48 }
  0x39   :  { %365 = vmatprep.subr.bf16.mxu0 %v1310_v18  ;;  %v1318_v26 = vcombine.high %v135_v23, %v139_v24  ;;  %v140_v27 = vld [vmem:[#allocation8 + $0x68] sm:$0xff]  ;;  %v1317_v29 = vcombine.low %v135_v23, %v139_v24  ;;  %v143_v31 = vld [vmem:[#allocation8 + $0x80] sm:$0xff]  ;;  %v134_v52 = vld [vmem:[#allocation8 + $0x38] sm:$0xff] }
  0x3a   :  { %408 = vmatprep.subr.bf16.mxu1 %v1312_v20  ;;  %366 = vmatpush1.bf16.msra.mxu0 %v1309_v21  ;;  %v1320_v28 = vcombine.high %v136_v25, %v140_v27  ;;  %v1319_v30 = vcombine.low %v136_v25, %v140_v27  ;;  %v147_v32 = vld [vmem:[#allocation8 + $0xa0] sm:$0xff]  ;;  %v144_v33 = vld [vmem:[#allocation8 + $0x88] sm:$0xff]  ;;  %v1315_v54 = vcombine.low %v130_v49, %v134_v52  ;;  %v145_v17 = vld [vmem:[#allocation8 + $0x90] sm:$0xff] }
  0x3b   :  { %101 = vadd.xlane.f32.xlu0 %v100_v4  ;;  %409 = vmatpush1.bf16.msra.mxu1 %v1311_v22  ;;  %v1326_v34 = vcombine.high %v143_v31, %v147_v32  ;;  %v148_v35 = vld [vmem:[#allocation8 + $0xa8] sm:$0xff]  ;;  %v1325_v37 = vcombine.low %v143_v31, %v147_v32  ;;  %v151_v39 = vld [vmem:[#allocation8 + $0xc0] sm:$0xff]  ;;  %v1316_v55 = vcombine.high %v130_v49, %v134_v52  ;;  %v149_v18 = vld [vmem:[#allocation8 + $0xb0] sm:$0xff]  ;;  %v162_v31 = vshrl.u32 %v93_v62, 7 }
  0x3c   :  { %367 = vmatprep.subr.bf16.mxu0 %v1318_v26  ;;  %410 = vmatprep.subr.bf16.mxu1 %v1320_v28  ;;  %v1328_v36 = vcombine.high %v144_v33, %v148_v35  ;;  %v1327_v38 = vcombine.low %v144_v33, %v148_v35  ;;  %v155_v40 = vld [vmem:[#allocation8 + $0xe0] sm:$0xff]  ;;  %v152_v41 = vld [vmem:[#allocation8 + $0xc8] sm:$0xff]  ;;  %v146_v19 = vld [vmem:[#allocation8 + $0x98] sm:$0xff]  ;;  %v1329_v25 = vcombine.low %v145_v17, %v149_v18 }
  0x3d   :  { %v1334_v42 = vcombine.high %v151_v39, %v155_v40  ;;  %v156_v43 = vld [vmem:[#allocation8 + $0xe8] sm:$0xff]  ;;  %v1333_v45 = vcombine.low %v151_v39, %v155_v40  ;;  %v153_v21 = vld [vmem:[#allocation8 + $0xd0] sm:$0xff]  ;;  %v154_v23 = vld [vmem:[#allocation8 + $0xd8] sm:$0xff]  ;;  %v1596_v32 = vsub.s32 0, %v162_v31  ;;  %v1598_v33 = vsub.s32 2, %v162_v31 }
  0x3e   :  { %368 = vmatpush1.bf16.msra.mxu0 %v1317_v29  ;;  %v1336_v44 = vcombine.high %v152_v41, %v156_v43  ;;  %v1335_v46 = vcombine.low %v152_v41, %v156_v43  ;;  %v157_v22 = vld [vmem:[#allocation8 + $0xf0] sm:$0xff]  ;;  %v158_v24 = vld [vmem:[#allocation8 + $0xf8] sm:$0xff]  ;;  %v1603_v35 = vsub.s32 1, %v162_v31 }
  0x3f   :  { %411 = vmatpush1.bf16.msra.mxu1 %v1319_v30  ;;  %369 = vmatprep.subr.bf16.mxu0 %v1326_v34  ;;  %v1338_v27 = vcombine.high %v153_v21, %v157_v22  ;;  %v1340_v28 = vcombine.high %v154_v23, %v158_v24  ;;  %v1337_v29 = vcombine.low %v153_v21, %v157_v22  ;;  %v159_v34 = vld [vmem:[%s1709_s2] sm:$0xff] }
  0x40   :  { %412 = vmatprep.subr.bf16.mxu1 %v1328_v36  ;;  %v1339_v30 = vcombine.low %v154_v23, %v158_v24  ;;  %v1605_v36 = vsub.s32 3, %v162_v31  ;;  %v168_v39 = vrot.slane %v159_v34, %v1603_v35 }
  0x42   :  { %370 = vmatpush1.bf16.msra.mxu0 %v1325_v37  ;;  %v164_v37 = vrot.slane %v159_v34, %v1596_v32  ;;  %v176_v40 = vrot.slane %v159_v34, %v1605_v36 }
  0x43   :  { %413 = vmatpush1.bf16.msra.mxu1 %v1327_v38  ;;  %371 = vmatprep.subr.bf16.mxu0 %v1334_v42  ;;  %v172_v38 = vrot.slane %v159_v34, %v1598_v33 }
  0x44   :  { %414 = vmatprep.subr.bf16.mxu1 %v1336_v44 }
  0x46   :  { %372 = vmatpush1.bf16.msra.mxu0 %v1333_v45 }
  0x47   :  { %415 = vmatpush1.bf16.msra.mxu1 %v1335_v46  ;;  %451 = vmatprep.subr.bf16.mxu0 %v1314_v51 }
  0x48   :  { %494 = vmatprep.subr.bf16.mxu1 %v1316_v55 }
  0xc4   :  { %v99_v5 = vpop.xlane.xlu0 %98 }
  0xc5   :  { %v104_v6 = vmul.f32 0.03125, %v99_v5  ;;  %v137_v5 = vld [vmem:[#allocation8 + $0x50] sm:$0xff] }
  0xc7   :  { %v1577_v7 = vsub.f32 %v1568_v1, %v104_v6 }
  0xc8   :  { %v102_v8 = vpop.xlane.xlu0 %101 }
  0xc9   :  { %v105_v9 = vmul.f32 0.03125, %v102_v8  ;;  %v108_v10 = vmul.f32 %v1577_v7, %v1577_v7  ;;  %v141_v8 = vld [vmem:[#allocation8 + $0x70] sm:$0xff] }
  0xca   :  { %v1322_v15 = vcombine.high %v137_v5, %v141_v8 }
  0xcb   :  { %v1582_v11 = vsub.f32 %v1570_v2, %v105_v9  ;;  %v110_v12 = vsel %vm96_vm0, %v108_v10, 0.0  ;;  %v138_v9 = vld [vmem:[#allocation8 + $0x58] sm:$0xff] }
  0xcc   :  { %111 = vadd.xlane.f32.xlu1 %v110_v12  ;;  %v142_v10 = vld [vmem:[#allocation8 + $0x78] sm:$0xff] }
  0xcd   :  { %v109_v13 = vmul.f32 %v1582_v11, %v1582_v11  ;;  %v1324_v16 = vcombine.high %v138_v9, %v142_v10  ;;  %v1323_v20 = vcombine.low %v138_v9, %v142_v10 }
  0xcf   :  { %v113_v14 = vsel %vm96_vm0, %v109_v13, 0.0 }
  0xd0   :  { %114 = vadd.xlane.f32.xlu1 %v113_v14 }
 0x159   :  { %v112_v56 = vpop.xlane.xlu1 %111 }
 0x15a   :  { %v116_v57 = vmul.f32 0.03125, %v112_v56 }
 0x15c   :  { %v118_v58 = vadd.f32 1e-05, %v116_v57 }
 0x15d   :  { %v115_v59 = vpop.xlane.xlu1 %114 }
 0x15e   :  { %1394 = vrsqrt.f32 %v118_v58  ;;  %v117_v60 = vmul.f32 0.03125, %v115_v59 }
 0x160   :  { %v119_v61 = vadd.f32 1e-05, %v117_v60 }
 0x162   :  { %1396 = vrsqrt.f32 %v119_v61 }
 0x168   :  { %v1395_v63 = vpop.eup %1394 }
 0x169   :  { %v122_v3 = vmul.f32 %v1395_v63, %v1577_v7  ;;  %v150_v7 = vld [vmem:[#allocation8 + $0xb8] sm:$0xff] }
 0x16a   :  { %v1331_v26 = vcombine.low %v146_v19, %v150_v7 }
 0x16b   :  { %v124_v12 = vsel %vm95_vm1, %v122_v3, %v1568_v1  ;;  %v1330_v1 = vcombine.high %v145_v17, %v149_v18  ;;  %v179_v3 = vsub.s32 4, %v162_v31 }
 0x16c   :  { %v1397_v4 = vpop.eup %1396 }
 0x16d   :  { %v123_v6 = vmul.f32 %v1397_v4, %v1582_v11  ;;  %v1321_v11 = vcombine.low %v137_v5, %v141_v8  ;;  %v187_v4 = vsub.s32 6, %v162_v31  ;;  %v183_v5 = vsub.s32 5, %v162_v31 }
 0x16e   :  { %v180_v8 = vrot.slane %v159_v34, %v179_v3 }
 0x16f   :  { %v125_v13 = vsel %vm95_vm1, %v123_v6, %v1570_v2  ;;  %v1332_v2 = vcombine.high %v146_v19, %v150_v7  ;;  %v191_v6 = vsub.s32 7, %v162_v31  ;;  %v188_v9 = vrot.slane %v159_v34, %v187_v4 }
 0x170   :  { %v126_v14 = vpack.c.bf16 %v125_v13, %v124_v12  ;;  %v184_v10 = vrot.slane %v159_v34, %v183_v5 }
 0x171   :  { %v192_v12 = vrot.slane %v159_v34, %v191_v6 }
 0x172   :  { %1341 = vmatmul.mubr.msk.bf16.vlgmr.msra.gmra.mrb[0].mxu0 %vm361_vm2, %v126_v14  ;;  %1342 = vmatmul.mubr.msk.bf16.vlgmr.msra.gmra.mrb[0].mxu1 %vm361_vm2, %v126_v14 }
 0x173   :  { %452 = vmatpush1.bf16.msra.mxu0 %v1313_v50  ;;  %495 = vmatpush1.bf16.msra.mxu1 %v1315_v54 }
 0x174   :  { %453 = vmatprep.subr.bf16.mxu0 %v1322_v15  ;;  %496 = vmatprep.subr.bf16.mxu1 %v1324_v16 }
 0x175   :  { %483 = vmatprep.mubr.bf16.mxu0 %v1493_v53  ;;  %526 = vmatprep.mubr.bf16.mxu1 %v1493_v53 }
 0x177   :  { %454 = vmatpush1.bf16.msra.mxu0 %v1321_v11  ;;  %497 = vmatpush1.bf16.msra.mxu1 %v1323_v20 }
 0x178   :  { %455 = vmatprep.subr.bf16.mxu0 %v1330_v1  ;;  %498 = vmatprep.subr.bf16.mxu1 %v1332_v2 }
 0x17b   :  { %456 = vmatpush1.bf16.msra.mxu0 %v1329_v25  ;;  %499 = vmatpush1.bf16.msra.mxu1 %v1331_v26 }
 0x17c   :  { %457 = vmatprep.subr.bf16.mxu0 %v1338_v27  ;;  %500 = vmatprep.subr.bf16.mxu1 %v1340_v28 }
 0x17f   :  { %458 = vmatpush1.bf16.msra.mxu0 %v1337_v29  ;;  %501 = vmatpush1.bf16.msra.mxu1 %v1339_v30 }
 0x182   :  { %1343 = vmatmul.mubr.msk.bf16.vlgmr.msra.gmra.mrb[4].mxu0 %vm361_vm2, %v126_v14  ;;  %1344 = vmatmul.mubr.msk.bf16.vlgmr.msra.gmra.mrb[4].mxu1 %vm361_vm2, %v126_v14 }
 0x245   :  { %v399_v41 = vpop.f32.mrb[0].mxu0  ;;  %v442_v42 = vpop.f32.mrb[0].mxu1 }
 0x246   :  { %v1611_v43 = vadd.f32 %v399_v41, %v164_v37  ;;  %v1613_v44 = vadd.f32 %v442_v42, %v172_v38  ;;  %v401_v45 = vpop.f32.mrb[1].mxu0  ;;  %v444_v46 = vpop.f32.mrb[1].mxu1 }
 0x247   :  { %v402_v47 = vadd.f32 %v401_v45, %v168_v39  ;;  %v1615_v48 = vadd.f32 %v444_v46, %v176_v40  ;;  %v403_v49 = vpop.f32.mrb[2].mxu0  ;;  %v446_v50 = vpop.f32.mrb[2].mxu1 }
 0x248   :  { %v537_v51 = vmax.f32 %v1611_v43, 0.0  ;;  %v539_v52 = vmax.f32 %v1613_v44, 0.0  ;;  %v1619_v53 = vadd.f32 %v403_v49, %v164_v37  ;;  %v1621_v54 = vadd.f32 %v446_v50, %v172_v38  ;;  %v405_v55 = vpop.f32.mrb[3].mxu0  ;;  %v448_v56 = vpop.f32.mrb[3].mxu1 }
 0x249   :  { %v538_v57 = vmax.f32 %v402_v47, 0.0  ;;  %v540_v58 = vmax.f32 %v1615_v48, 0.0  ;;  %v406_v59 = vadd.f32 %v405_v55, %v168_v39  ;;  %v1624_v60 = vadd.f32 %v448_v56, %v176_v40 }
 0x24a   :  { %v545_v61 = vmax.f32 %v1619_v53, 0.0  ;;  %v547_v62 = vmax.f32 %v1621_v54, 0.0 }
 0x24b   :  { %v546_v63 = vmax.f32 %v406_v59, 0.0  ;;  %v548_v0 = vmax.f32 %v1624_v60, 0.0 }
 0x255   :  { %v485_v13 = vpop.f32.mrb[4].mxu0  ;;  %v528_v14 = vpop.f32.mrb[4].mxu1 }
 0x256   :  { %v1629_v15 = vadd.f32 %v485_v13, %v180_v8  ;;  %v1631_v16 = vadd.f32 %v528_v14, %v188_v9  ;;  %v487_v17 = vpop.f32.mrb[5].mxu0  ;;  %v530_v18 = vpop.f32.mrb[5].mxu1 }
 0x257   :  { %v1633_v19 = vadd.f32 %v487_v17, %v184_v10  ;;  %v1635_v7 = vadd.f32 %v530_v18, %v192_v12  ;;  %v489_v11 = vpop.f32.mrb[6].mxu0  ;;  %v532_v20 = vpop.f32.mrb[6].mxu1 }
 0x258   :  { %v541_v1 = vmax.f32 %v1629_v15, 0.0  ;;  %v543_v2 = vmax.f32 %v1631_v16, 0.0  ;;  %v1639_v21 = vadd.f32 %v489_v11, %v180_v8  ;;  %v1641_v22 = vadd.f32 %v532_v20, %v188_v9  ;;  %v491_v23 = vpop.f32.mrb[7].mxu0  ;;  %v534_v24 = vpop.f32.mrb[7].mxu1 }
 0x259   :  { %v542_v25 = vmax.f32 %v1633_v19, 0.0  ;;  %v544_v26 = vmax.f32 %v1635_v7, 0.0  ;;  %v1645_v27 = vadd.f32 %v491_v23, %v184_v10  ;;  %v1647_v28 = vadd.f32 %v534_v24, %v192_v12 }
 0x25a   :  { %v549_v29 = vmax.f32 %v1639_v21, 0.0  ;;  %v551_v30 = vmax.f32 %v1641_v22, 0.0 }
 0x25b   :  { %v550_v31 = vmax.f32 %v1645_v27, 0.0  ;;  %v552_v34 = vmax.f32 %v1647_v28, 0.0 }
 0x25c   :  { %1476 = dma.done.wait [#allocation3], 32768 }
 0x25d   :  { %1477 = vsyncadd [#allocation3], 4294934528  ;;  %v558_v37 = vpack.c.bf16 %v546_v63, %v538_v57  ;;  %v566_v38 = vld [vmem:[#allocation2 + $0x8] sm:$0xff]  ;;  %v568_v39 = vld [vmem:[#allocation2 + $0x18] sm:$0xff]  ;;  %vm1271_vm3 = vcmask 7168   ;;  %vm1283_vm4 = vcmask 0  }
 0x25e   :  { %v565_v40 = vld [vmem:[#allocation2] sm:$0xff]  ;;  %843 = vmatprep.subr.bf16.mxu0 %v566_v38  ;;  %1015 = vmatprep.subr.bf16.mxu1 %v568_v39  ;;  %v567_v41 = vld [vmem:[#allocation2 + $0x10] sm:$0xff]  ;;  %v570_v42 = vld [vmem:[#allocation2 + $0x28] sm:$0xff] }
 0x25f   :  { %875 = vmatprep.mubr.bf16.mxu0 %v558_v37  ;;  %1047 = vmatprep.mubr.bf16.mxu1 %v558_v37  ;;  %v572_v45 = vld [vmem:[#allocation2 + $0x38] sm:$0xff]  ;;  %v569_v46 = vld [vmem:[#allocation2 + $0x20] sm:$0xff]  ;;  %v571_v47 = vld [vmem:[#allocation2 + $0x30] sm:$0xff] }
 0x260   :  { %844 = vmatpush1.bf16.msra.mxu0 %v565_v40  ;;  %1016 = vmatpush1.bf16.msra.mxu1 %v567_v41  ;;  %v574_v49 = vld [vmem:[#allocation2 + $0x48] sm:$0xff]  ;;  %v576_v50 = vld [vmem:[#allocation2 + $0x58] sm:$0xff]  ;;  %v573_v55 = vld [vmem:[#allocation2 + $0x40] sm:$0xff] }
 0x261   :  { %845 = vmatprep.subr.bf16.mxu0 %v570_v42  ;;  %1017 = vmatprep.subr.bf16.mxu1 %v572_v45  ;;  %v575_v56 = vld [vmem:[#allocation2 + $0x50] sm:$0xff]  ;;  %v578_v57 = vld [vmem:[#allocation2 + $0x68] sm:$0xff]  ;;  %v580_v59 = vld [vmem:[#allocation2 + $0x78] sm:$0xff] }
 0x262   :  { %v577_v63 = vld [vmem:[#allocation2 + $0x60] sm:$0xff]  ;;  %v579_v3 = vld [vmem:[#allocation2 + $0x70] sm:$0xff]  ;;  %v582_v4 = vld [vmem:[#allocation2 + $0x88] sm:$0xff] }
 0x263   :  { %v584_v5 = vld [vmem:[#allocation2 + $0x98] sm:$0xff]  ;;  %v581_v6 = vld [vmem:[#allocation2 + $0x80] sm:$0xff]  ;;  %v583_v8 = vld [vmem:[#allocation2 + $0x90] sm:$0xff] }
 0x264   :  { %846 = vmatpush1.bf16.msra.mxu0 %v569_v46  ;;  %1018 = vmatpush1.bf16.msra.mxu1 %v571_v47  ;;  %v586_v9 = vld [vmem:[#allocation2 + $0xa8] sm:$0xff]  ;;  %v588_v10 = vld [vmem:[#allocation2 + $0xb8] sm:$0xff]  ;;  %v585_v12 = vld [vmem:[#allocation2 + $0xa0] sm:$0xff] }
 0x265   :  { %847 = vmatprep.subr.bf16.mxu0 %v574_v49  ;;  %1019 = vmatprep.subr.bf16.mxu1 %v576_v50  ;;  %v587_v13 = vld [vmem:[#allocation2 + $0xb0] sm:$0xff]  ;;  %v590_v14 = vld [vmem:[#allocation2 + $0xc8] sm:$0xff]  ;;  %v592_v17 = vld [vmem:[#allocation2 + $0xd8] sm:$0xff] }
 0x266   :  { %v589_v18 = vld [vmem:[#allocation2 + $0xc0] sm:$0xff]  ;;  %v591_v11 = vld [vmem:[#allocation2 + $0xd0] sm:$0xff]  ;;  %v594_v20 = vld [vmem:[#allocation2 + $0xe8] sm:$0xff] }
 0x267   :  { %v596_v23 = vld [vmem:[#allocation2 + $0xf8] sm:$0xff]  ;;  %v593_v24 = vld [vmem:[#allocation2 + $0xe0] sm:$0xff]  ;;  %v595_v37 = vld [vmem:[#allocation2 + $0xf0] sm:$0xff] }
 0x268   :  { %848 = vmatpush1.bf16.msra.mxu0 %v573_v55  ;;  %1020 = vmatpush1.bf16.msra.mxu1 %v575_v56  ;;  %v598_v38 = vld [vmem:[#allocation2 + $0x108] sm:$0xff]  ;;  %v600_v39 = vld [vmem:[#allocation2 + $0x118] sm:$0xff]  ;;  %v597_v40 = vld [vmem:[#allocation2 + $0x100] sm:$0xff] }
 0x269   :  { %849 = vmatprep.subr.bf16.mxu0 %v578_v57  ;;  %1021 = vmatprep.subr.bf16.mxu1 %v580_v59  ;;  %v599_v41 = vld [vmem:[#allocation2 + $0x110] sm:$0xff]  ;;  %v602_v42 = vld [vmem:[#allocation2 + $0x128] sm:$0xff]  ;;  %v604_v45 = vld [vmem:[#allocation2 + $0x138] sm:$0xff] }
 0x26a   :  { %v601_v46 = vld [vmem:[#allocation2 + $0x120] sm:$0xff]  ;;  %v603_v47 = vld [vmem:[#allocation2 + $0x130] sm:$0xff]  ;;  %v606_v49 = vld [vmem:[#allocation2 + $0x148] sm:$0xff] }
 0x26b   :  { %v608_v50 = vld [vmem:[#allocation2 + $0x158] sm:$0xff]  ;;  %v605_v55 = vld [vmem:[#allocation2 + $0x140] sm:$0xff]  ;;  %v607_v56 = vld [vmem:[#allocation2 + $0x150] sm:$0xff] }
 0x26c   :  { %850 = vmatpush1.bf16.msra.mxu0 %v577_v63  ;;  %1022 = vmatpush1.bf16.msra.mxu1 %v579_v3  ;;  %v610_v57 = vld [vmem:[#allocation2 + $0x168] sm:$0xff]  ;;  %v612_v59 = vld [vmem:[#allocation2 + $0x178] sm:$0xff]  ;;  %v609_v63 = vld [vmem:[#allocation2 + $0x160] sm:$0xff] }
 0x26d   :  { %851 = vmatprep.subr.bf16.mxu0 %v582_v4  ;;  %1023 = vmatprep.subr.bf16.mxu1 %v584_v5  ;;  %v611_v3 = vld [vmem:[#allocation2 + $0x170] sm:$0xff]  ;;  %v614_v4 = vld [vmem:[#allocation2 + $0x188] sm:$0xff]  ;;  %v616_v5 = vld [vmem:[#allocation2 + $0x198] sm:$0xff] }
 0x26e   :  { %v633_v43 = vld [vmem:[#allocation2 + $0x220] sm:$0xff]  ;;  %v638_v53 = vld [vmem:[#allocation2 + $0x248] sm:$0xff] }
 0x26f   :  { %v637_v48 = vld [vmem:[#allocation2 + $0x240] sm:$0xff]  ;;  %v642_v60 = vld [vmem:[#allocation2 + $0x268] sm:$0xff] }
 0x270   :  { %852 = vmatpush1.bf16.msra.mxu0 %v581_v6  ;;  %1024 = vmatpush1.bf16.msra.mxu1 %v583_v8  ;;  %v613_v6 = vld [vmem:[#allocation2 + $0x180] sm:$0xff]  ;;  %v615_v8 = vld [vmem:[#allocation2 + $0x190] sm:$0xff]  ;;  %v702_v54 = vld [vmem:[#allocation2 + $0x448] sm:$0xff] }
 0x271   :  { %853 = vmatprep.subr.bf16.mxu0 %v586_v9  ;;  %1025 = vmatprep.subr.bf16.mxu1 %v588_v10  ;;  %v618_v9 = vld [vmem:[#allocation2 + $0x1a8] sm:$0xff]  ;;  %v620_v10 = vld [vmem:[#allocation2 + $0x1b8] sm:$0xff]  ;;  %v697_v44 = vld [vmem:[#allocation2 + $0x420] sm:$0xff] }
 0x272   :  { %v701_v19 = vld [vmem:[#allocation2 + $0x440] sm:$0xff]  ;;  %v706_v27 = vld [vmem:[#allocation2 + $0x468] sm:$0xff] }
 0x273   :  { %v761_v15 = vld [vmem:[#allocation2 + $0x620] sm:$0xff]  ;;  %v766_v21 = vld [vmem:[#allocation2 + $0x648] sm:$0xff] }
 0x274   :  { %854 = vmatpush1.bf16.msra.mxu0 %v585_v12  ;;  %1026 = vmatpush1.bf16.msra.mxu1 %v587_v13  ;;  %v617_v12 = vld [vmem:[#allocation2 + $0x1a0] sm:$0xff]  ;;  %v619_v13 = vld [vmem:[#allocation2 + $0x1b0] sm:$0xff]  ;;  %v770_v28 = vld [vmem:[#allocation2 + $0x668] sm:$0xff] }
 0x275   :  { %855 = vmatprep.subr.bf16.mxu0 %v590_v14  ;;  %1027 = vmatprep.subr.bf16.mxu1 %v592_v17  ;;  %v622_v14 = vld [vmem:[#allocation2 + $0x1c8] sm:$0xff]  ;;  %v624_v17 = vld [vmem:[#allocation2 + $0x1d8] sm:$0xff]  ;;  %v765_v7 = vld [vmem:[#allocation2 + $0x640] sm:$0xff] }
 0x278   :  { %856 = vmatpush1.bf16.msra.mxu0 %v589_v18  ;;  %1028 = vmatpush1.bf16.msra.mxu1 %v591_v11  ;;  %v621_v18 = vld [vmem:[#allocation2 + $0x1c0] sm:$0xff]  ;;  %v623_v11 = vld [vmem:[#allocation2 + $0x1d0] sm:$0xff] }
 0x279   :  { %857 = vmatprep.subr.bf16.mxu0 %v594_v20  ;;  %1029 = vmatprep.subr.bf16.mxu1 %v596_v23  ;;  %v626_v20 = vld [vmem:[#allocation2 + $0x1e8] sm:$0xff]  ;;  %v628_v23 = vld [vmem:[#allocation2 + $0x1f8] sm:$0xff] }
 0x27c   :  { %858 = vmatpush1.bf16.msra.mxu0 %v593_v24  ;;  %1030 = vmatpush1.bf16.msra.mxu1 %v595_v37  ;;  %v625_v24 = vld [vmem:[#allocation2 + $0x1e0] sm:$0xff]  ;;  %v627_v37 = vld [vmem:[#allocation2 + $0x1f0] sm:$0xff] }
 0x27d   :  { %859 = vmatprep.subr.bf16.mxu0 %v598_v38  ;;  %1031 = vmatprep.subr.bf16.mxu1 %v600_v39  ;;  %v630_v38 = vld [vmem:[#allocation2 + $0x208] sm:$0xff]  ;;  %v632_v39 = vld [vmem:[#allocation2 + $0x218] sm:$0xff] }
 0x280   :  { %860 = vmatpush1.bf16.msra.mxu0 %v597_v40  ;;  %1032 = vmatpush1.bf16.msra.mxu1 %v599_v41  ;;  %v557_v40 = vpack.c.bf16 %v545_v61, %v537_v51  ;;  %v629_v41 = vld [vmem:[#allocation2 + $0x200] sm:$0xff]  ;;  %v635_v51 = vld [vmem:[#allocation2 + $0x230] sm:$0xff]  ;;  %v640_v61 = vld [vmem:[#allocation2 + $0x258] sm:$0xff] }
 0x281   :  { %861 = vmatprep.subr.bf16.mxu0 %v602_v42  ;;  %1033 = vmatprep.subr.bf16.mxu1 %v604_v45  ;;  %v631_v42 = vld [vmem:[#allocation2 + $0x210] sm:$0xff]  ;;  %v634_v45 = vld [vmem:[#allocation2 + $0x228] sm:$0xff] }
 0x284   :  { %862 = vmatpush1.bf16.msra.mxu0 %v601_v46  ;;  %1034 = vmatpush1.bf16.msra.mxu1 %v603_v47  ;;  %v636_v46 = vld [vmem:[#allocation2 + $0x238] sm:$0xff]  ;;  %v560_v47 = vpack.c.bf16 %v548_v0, %v540_v58  ;;  %v641_v0 = vld [vmem:[#allocation2 + $0x260] sm:$0xff] }
 0x285   :  { %863 = vmatprep.subr.bf16.mxu0 %v606_v49  ;;  %1035 = vmatprep.subr.bf16.mxu1 %v608_v50  ;;  %v639_v49 = vld [vmem:[#allocation2 + $0x250] sm:$0xff]  ;;  %v644_v58 = vld [vmem:[#allocation2 + $0x278] sm:$0xff] }
 0x286   :  { %v643_v50 = vld [vmem:[#allocation2 + $0x270] sm:$0xff] }
 0x288   :  { %864 = vmatpush1.bf16.msra.mxu0 %v605_v55  ;;  %1036 = vmatpush1.bf16.msra.mxu1 %v607_v56  ;;  %v646_v55 = vld [vmem:[#allocation2 + $0x288] sm:$0xff]  ;;  %v648_v56 = vld [vmem:[#allocation2 + $0x298] sm:$0xff] }
 0x289   :  { %865 = vmatprep.subr.bf16.mxu0 %v610_v57  ;;  %1037 = vmatprep.subr.bf16.mxu1 %v612_v59  ;;  %v645_v57 = vld [vmem:[#allocation2 + $0x280] sm:$0xff]  ;;  %v647_v59 = vld [vmem:[#allocation2 + $0x290] sm:$0xff] }
 0x28c   :  { %866 = vmatpush1.bf16.msra.mxu0 %v609_v63  ;;  %1038 = vmatpush1.bf16.msra.mxu1 %v611_v3  ;;  %v650_v63 = vld [vmem:[#allocation2 + $0x2a8] sm:$0xff]  ;;  %v652_v3 = vld [vmem:[#allocation2 + $0x2b8] sm:$0xff] }
 0x28d   :  { %867 = vmatprep.subr.bf16.mxu0 %v614_v4  ;;  %1039 = vmatprep.subr.bf16.mxu1 %v616_v5  ;;  %v649_v4 = vld [vmem:[#allocation2 + $0x2a0] sm:$0xff]  ;;  %v651_v5 = vld [vmem:[#allocation2 + $0x2b0] sm:$0xff] }
 0x290   :  { %868 = vmatpush1.bf16.msra.mxu0 %v613_v6  ;;  %1040 = vmatpush1.bf16.msra.mxu1 %v615_v8  ;;  %v654_v6 = vld [vmem:[#allocation2 + $0x2c8] sm:$0xff]  ;;  %v656_v8 = vld [vmem:[#allocation2 + $0x2d8] sm:$0xff] }
 0x291   :  { %869 = vmatprep.subr.bf16.mxu0 %v618_v9  ;;  %1041 = vmatprep.subr.bf16.mxu1 %v620_v10  ;;  %v653_v9 = vld [vmem:[#allocation2 + $0x2c0] sm:$0xff]  ;;  %v655_v10 = vld [vmem:[#allocation2 + $0x2d0] sm:$0xff] }
 0x294   :  { %870 = vmatpush1.bf16.msra.mxu0 %v617_v12  ;;  %1042 = vmatpush1.bf16.msra.mxu1 %v619_v13  ;;  %v658_v12 = vld [vmem:[#allocation2 + $0x2e8] sm:$0xff]  ;;  %v660_v13 = vld [vmem:[#allocation2 + $0x2f8] sm:$0xff] }
 0x295   :  { %871 = vmatprep.subr.bf16.mxu0 %v622_v14  ;;  %1043 = vmatprep.subr.bf16.mxu1 %v624_v17  ;;  %v657_v14 = vld [vmem:[#allocation2 + $0x2e0] sm:$0xff]  ;;  %v659_v17 = vld [vmem:[#allocation2 + $0x2f0] sm:$0xff] }
 0x298   :  { %872 = vmatpush1.bf16.msra.mxu0 %v621_v18  ;;  %1044 = vmatpush1.bf16.msra.mxu1 %v623_v11  ;;  %v662_v18 = vld [vmem:[#allocation2 + $0x308] sm:$0xff]  ;;  %v664_v11 = vld [vmem:[#allocation2 + $0x318] sm:$0xff] }
 0x299   :  { %873 = vmatprep.subr.bf16.mxu0 %v626_v20  ;;  %1045 = vmatprep.subr.bf16.mxu1 %v628_v23  ;;  %v661_v20 = vld [vmem:[#allocation2 + $0x300] sm:$0xff]  ;;  %v663_v23 = vld [vmem:[#allocation2 + $0x310] sm:$0xff] }
 0x29c   :  { %874 = vmatpush1.bf16.msra.mxu0 %v625_v24  ;;  %1046 = vmatpush1.bf16.msra.mxu1 %v627_v37  ;;  %v666_v24 = vld [vmem:[#allocation2 + $0x328] sm:$0xff]  ;;  %v668_v37 = vld [vmem:[#allocation2 + $0x338] sm:$0xff] }
 0x29d   :  { %886 = vmatprep.subr.bf16.mxu0 %v630_v38  ;;  %1058 = vmatprep.subr.bf16.mxu1 %v632_v39  ;;  %v665_v38 = vld [vmem:[#allocation2 + $0x320] sm:$0xff]  ;;  %v667_v39 = vld [vmem:[#allocation2 + $0x330] sm:$0xff] }
 0x29f   :  { %876 = vmatmul.mubr.bf16.vlgmr.msra.gmra.mrb[8].mxu0 %v557_v40  ;;  %1048 = vmatmul.mubr.bf16.vlgmr.msra.gmra.mrb[8].mxu1 %v557_v40  ;;  %v670_v40 = vld [vmem:[#allocation2 + $0x348] sm:$0xff] }
 0x2a0   :  { %887 = vmatpush1.bf16.msra.mxu0 %v629_v41  ;;  %1059 = vmatpush1.bf16.msra.mxu1 %v631_v42  ;;  %v672_v41 = vld [vmem:[#allocation2 + $0x358] sm:$0xff]  ;;  %v669_v42 = vld [vmem:[#allocation2 + $0x340] sm:$0xff] }
 0x2a1   :  { %888 = vmatprep.subr.bf16.mxu0 %v634_v45  ;;  %1060 = vmatprep.subr.bf16.mxu1 %v636_v46  ;;  %v671_v45 = vld [vmem:[#allocation2 + $0x350] sm:$0xff]  ;;  %v674_v46 = vld [vmem:[#allocation2 + $0x368] sm:$0xff] }
 0x2a2   :  { %918 = vmatprep.mubr.bf16.mxu0 %v560_v47  ;;  %1090 = vmatprep.mubr.bf16.mxu1 %v560_v47  ;;  %v676_v47 = vld [vmem:[#allocation2 + $0x378] sm:$0xff] }
 0x2a4   :  { %889 = vmatpush1.bf16.msra.mxu0 %v633_v43  ;;  %1061 = vmatpush1.bf16.msra.mxu1 %v635_v51  ;;  %v673_v43 = vld [vmem:[#allocation2 + $0x360] sm:$0xff]  ;;  %v675_v51 = vld [vmem:[#allocation2 + $0x370] sm:$0xff] }
 0x2a5   :  { %890 = vmatprep.subr.bf16.mxu0 %v638_v53  ;;  %1062 = vmatprep.subr.bf16.mxu1 %v640_v61  ;;  %v678_v53 = vld [vmem:[#allocation2 + $0x388] sm:$0xff]  ;;  %v680_v61 = vld [vmem:[#allocation2 + $0x398] sm:$0xff] }
 0x2a8   :  { %891 = vmatpush1.bf16.msra.mxu0 %v637_v48  ;;  %1063 = vmatpush1.bf16.msra.mxu1 %v639_v49  ;;  %v677_v48 = vld [vmem:[#allocation2 + $0x380] sm:$0xff]  ;;  %v679_v49 = vld [vmem:[#allocation2 + $0x390] sm:$0xff] }
 0x2a9   :  { %892 = vmatprep.subr.bf16.mxu0 %v642_v60  ;;  %1064 = vmatprep.subr.bf16.mxu1 %v644_v58  ;;  %v682_v60 = vld [vmem:[#allocation2 + $0x3a8] sm:$0xff]  ;;  %v684_v58 = vld [vmem:[#allocation2 + $0x3b8] sm:$0xff] }
 0x2ac   :  { %893 = vmatpush1.bf16.msra.mxu0 %v641_v0  ;;  %1065 = vmatpush1.bf16.msra.mxu1 %v643_v50  ;;  %v681_v0 = vld [vmem:[#allocation2 + $0x3a0] sm:$0xff]  ;;  %v683_v50 = vld [vmem:[#allocation2 + $0x3b0] sm:$0xff] }
 0x2ad   :  { %894 = vmatprep.subr.bf16.mxu0 %v646_v55  ;;  %1066 = vmatprep.subr.bf16.mxu1 %v648_v56  ;;  %v686_v55 = vld [vmem:[#allocation2 + $0x3c8] sm:$0xff]  ;;  %v688_v56 = vld [vmem:[#allocation2 + $0x3d8] sm:$0xff] }
 0x2b0   :  { %895 = vmatpush1.bf16.msra.mxu0 %v645_v57  ;;  %1067 = vmatpush1.bf16.msra.mxu1 %v647_v59  ;;  %v685_v57 = vld [vmem:[#allocation2 + $0x3c0] sm:$0xff]  ;;  %v687_v59 = vld [vmem:[#allocation2 + $0x3d0] sm:$0xff] }
 0x2b1   :  { %896 = vmatprep.subr.bf16.mxu0 %v650_v63  ;;  %1068 = vmatprep.subr.bf16.mxu1 %v652_v3  ;;  %v690_v63 = vld [vmem:[#allocation2 + $0x3e8] sm:$0xff]  ;;  %v692_v3 = vld [vmem:[#allocation2 + $0x3f8] sm:$0xff] }
 0x2b4   :  { %897 = vmatpush1.bf16.msra.mxu0 %v649_v4  ;;  %1069 = vmatpush1.bf16.msra.mxu1 %v651_v5  ;;  %v689_v4 = vld [vmem:[#allocation2 + $0x3e0] sm:$0xff]  ;;  %v691_v5 = vld [vmem:[#allocation2 + $0x3f0] sm:$0xff] }
 0x2b5   :  { %898 = vmatprep.subr.bf16.mxu0 %v654_v6  ;;  %1070 = vmatprep.subr.bf16.mxu1 %v656_v8  ;;  %v694_v6 = vld [vmem:[#allocation2 + $0x408] sm:$0xff]  ;;  %v696_v8 = vld [vmem:[#allocation2 + $0x418] sm:$0xff] }
 0x2b8   :  { %899 = vmatpush1.bf16.msra.mxu0 %v653_v9  ;;  %1071 = vmatpush1.bf16.msra.mxu1 %v655_v10  ;;  %v559_v9 = vpack.c.bf16 %v547_v62, %v539_v52  ;;  %v693_v10 = vld [vmem:[#allocation2 + $0x400] sm:$0xff]  ;;  %v699_v52 = vld [vmem:[#allocation2 + $0x430] sm:$0xff]  ;;  %v704_v62 = vld [vmem:[#allocation2 + $0x458] sm:$0xff] }
 0x2b9   :  { %900 = vmatprep.subr.bf16.mxu0 %v658_v12  ;;  %1072 = vmatprep.subr.bf16.mxu1 %v660_v13  ;;  %v695_v12 = vld [vmem:[#allocation2 + $0x410] sm:$0xff]  ;;  %v698_v13 = vld [vmem:[#allocation2 + $0x428] sm:$0xff] }
 0x2bc   :  { %901 = vmatpush1.bf16.msra.mxu0 %v657_v14  ;;  %1073 = vmatpush1.bf16.msra.mxu1 %v659_v17  ;;  %v700_v14 = vld [vmem:[#allocation2 + $0x438] sm:$0xff]  ;;  %v562_v17 = vpack.c.bf16 %v550_v31, %v542_v25  ;;  %v705_v31 = vld [vmem:[#allocation2 + $0x460] sm:$0xff] }
 0x2bd   :  { %902 = vmatprep.subr.bf16.mxu0 %v662_v18  ;;  %1074 = vmatprep.subr.bf16.mxu1 %v664_v11  ;;  %v703_v18 = vld [vmem:[#allocation2 + $0x450] sm:$0xff]  ;;  %v708_v25 = vld [vmem:[#allocation2 + $0x478] sm:$0xff] }
 0x2be   :  { %v707_v11 = vld [vmem:[#allocation2 + $0x470] sm:$0xff] }
 0x2c0   :  { %903 = vmatpush1.bf16.msra.mxu0 %v661_v20  ;;  %1075 = vmatpush1.bf16.msra.mxu1 %v663_v23  ;;  %v710_v20 = vld [vmem:[#allocation2 + $0x488] sm:$0xff]  ;;  %v712_v23 = vld [vmem:[#allocation2 + $0x498] sm:$0xff] }
 0x2c1   :  { %904 = vmatprep.subr.bf16.mxu0 %v666_v24  ;;  %1076 = vmatprep.subr.bf16.mxu1 %v668_v37  ;;  %v709_v24 = vld [vmem:[#allocation2 + $0x480] sm:$0xff]  ;;  %v711_v37 = vld [vmem:[#allocation2 + $0x490] sm:$0xff] }
 0x2c4   :  { %905 = vmatpush1.bf16.msra.mxu0 %v665_v38  ;;  %1077 = vmatpush1.bf16.msra.mxu1 %v667_v39  ;;  %v714_v38 = vld [vmem:[#allocation2 + $0x4a8] sm:$0xff]  ;;  %v716_v39 = vld [vmem:[#allocation2 + $0x4b8] sm:$0xff] }
 0x2c5   :  { %906 = vmatprep.subr.bf16.mxu0 %v670_v40  ;;  %1078 = vmatprep.subr.bf16.mxu1 %v672_v41  ;;  %v713_v40 = vld [vmem:[#allocation2 + $0x4a0] sm:$0xff]  ;;  %v715_v41 = vld [vmem:[#allocation2 + $0x4b0] sm:$0xff] }
 0x2c8   :  { %907 = vmatpush1.bf16.msra.mxu0 %v669_v42  ;;  %1079 = vmatpush1.bf16.msra.mxu1 %v671_v45  ;;  %v718_v42 = vld [vmem:[#allocation2 + $0x4c8] sm:$0xff]  ;;  %v720_v45 = vld [vmem:[#allocation2 + $0x4d8] sm:$0xff] }
 0x2c9   :  { %908 = vmatprep.subr.bf16.mxu0 %v674_v46  ;;  %1080 = vmatprep.subr.bf16.mxu1 %v676_v47  ;;  %v717_v46 = vld [vmem:[#allocation2 + $0x4c0] sm:$0xff]  ;;  %v719_v47 = vld [vmem:[#allocation2 + $0x4d0] sm:$0xff] }
 0x2cc   :  { %909 = vmatpush1.bf16.msra.mxu0 %v673_v43  ;;  %1081 = vmatpush1.bf16.msra.mxu1 %v675_v51  ;;  %v722_v43 = vld [vmem:[#allocation2 + $0x4e8] sm:$0xff]  ;;  %v724_v51 = vld [vmem:[#allocation2 + $0x4f8] sm:$0xff] }
 0x2cd   :  { %910 = vmatprep.subr.bf16.mxu0 %v678_v53  ;;  %1082 = vmatprep.subr.bf16.mxu1 %v680_v61  ;;  %v721_v53 = vld [vmem:[#allocation2 + $0x4e0] sm:$0xff]  ;;  %v723_v61 = vld [vmem:[#allocation2 + $0x4f0] sm:$0xff] }
 0x2d0   :  { %911 = vmatpush1.bf16.msra.mxu0 %v677_v48  ;;  %1083 = vmatpush1.bf16.msra.mxu1 %v679_v49  ;;  %v726_v48 = vld [vmem:[#allocation2 + $0x508] sm:$0xff]  ;;  %v728_v49 = vld [vmem:[#allocation2 + $0x518] sm:$0xff] }
 0x2d1   :  { %912 = vmatprep.subr.bf16.mxu0 %v682_v60  ;;  %1084 = vmatprep.subr.bf16.mxu1 %v684_v58  ;;  %v725_v60 = vld [vmem:[#allocation2 + $0x500] sm:$0xff]  ;;  %v727_v58 = vld [vmem:[#allocation2 + $0x510] sm:$0xff] }
 0x2d4   :  { %913 = vmatpush1.bf16.msra.mxu0 %v681_v0  ;;  %1085 = vmatpush1.bf16.msra.mxu1 %v683_v50  ;;  %v730_v0 = vld [vmem:[#allocation2 + $0x528] sm:$0xff]  ;;  %v732_v50 = vld [vmem:[#allocation2 + $0x538] sm:$0xff] }
 0x2d5   :  { %914 = vmatprep.subr.bf16.mxu0 %v686_v55  ;;  %1086 = vmatprep.subr.bf16.mxu1 %v688_v56  ;;  %v729_v55 = vld [vmem:[#allocation2 + $0x520] sm:$0xff]  ;;  %v731_v56 = vld [vmem:[#allocation2 + $0x530] sm:$0xff] }
 0x2d8   :  { %915 = vmatpush1.bf16.msra.mxu0 %v685_v57  ;;  %1087 = vmatpush1.bf16.msra.mxu1 %v687_v59  ;;  %v734_v57 = vld [vmem:[#allocation2 + $0x548] sm:$0xff]  ;;  %v736_v59 = vld [vmem:[#allocation2 + $0x558] sm:$0xff] }
 0x2d9   :  { %916 = vmatprep.subr.bf16.mxu0 %v690_v63  ;;  %1088 = vmatprep.subr.bf16.mxu1 %v692_v3  ;;  %v733_v63 = vld [vmem:[#allocation2 + $0x540] sm:$0xff]  ;;  %v735_v3 = vld [vmem:[#allocation2 + $0x550] sm:$0xff] }
 0x2dc   :  { %917 = vmatpush1.bf16.msra.mxu0 %v689_v4  ;;  %1089 = vmatpush1.bf16.msra.mxu1 %v691_v5  ;;  %v738_v4 = vld [vmem:[#allocation2 + $0x568] sm:$0xff]  ;;  %v740_v5 = vld [vmem:[#allocation2 + $0x578] sm:$0xff] }
 0x2dd   :  { %929 = vmatprep.subr.bf16.mxu0 %v694_v6  ;;  %1101 = vmatprep.subr.bf16.mxu1 %v696_v8  ;;  %v737_v6 = vld [vmem:[#allocation2 + $0x560] sm:$0xff]  ;;  %v739_v8 = vld [vmem:[#allocation2 + $0x570] sm:$0xff] }
 0x2df   :  { %919 = vmatmul.mubr.bf16.vlgmr.msra.gmra.mrb[8].mxu0 %v559_v9  ;;  %1091 = vmatmul.mubr.bf16.vlgmr.msra.gmra.mrb[8].mxu1 %v559_v9  ;;  %v742_v9 = vld [vmem:[#allocation2 + $0x588] sm:$0xff] }
 0x2e0   :  { %930 = vmatpush1.bf16.msra.mxu0 %v693_v10  ;;  %1102 = vmatpush1.bf16.msra.mxu1 %v695_v12  ;;  %v744_v10 = vld [vmem:[#allocation2 + $0x598] sm:$0xff]  ;;  %v741_v12 = vld [vmem:[#allocation2 + $0x580] sm:$0xff] }
 0x2e1   :  { %931 = vmatprep.subr.bf16.mxu0 %v698_v13  ;;  %1103 = vmatprep.subr.bf16.mxu1 %v700_v14  ;;  %v743_v13 = vld [vmem:[#allocation2 + $0x590] sm:$0xff]  ;;  %v746_v14 = vld [vmem:[#allocation2 + $0x5a8] sm:$0xff] }
 0x2e2   :  { %961 = vmatprep.mubr.bf16.mxu0 %v562_v17  ;;  %1133 = vmatprep.mubr.bf16.mxu1 %v562_v17  ;;  %v748_v17 = vld [vmem:[#allocation2 + $0x5b8] sm:$0xff] }
 0x2e4   :  { %932 = vmatpush1.bf16.msra.mxu0 %v697_v44  ;;  %1104 = vmatpush1.bf16.msra.mxu1 %v699_v52  ;;  %v745_v44 = vld [vmem:[#allocation2 + $0x5a0] sm:$0xff]  ;;  %v747_v52 = vld [vmem:[#allocation2 + $0x5b0] sm:$0xff] }
 0x2e5   :  { %933 = vmatprep.subr.bf16.mxu0 %v702_v54  ;;  %1105 = vmatprep.subr.bf16.mxu1 %v704_v62  ;;  %v750_v54 = vld [vmem:[#allocation2 + $0x5c8] sm:$0xff]  ;;  %v752_v62 = vld [vmem:[#allocation2 + $0x5d8] sm:$0xff] }
 0x2e8   :  { %934 = vmatpush1.bf16.msra.mxu0 %v701_v19  ;;  %1106 = vmatpush1.bf16.msra.mxu1 %v703_v18  ;;  %v749_v19 = vld [vmem:[#allocation2 + $0x5c0] sm:$0xff]  ;;  %v751_v18 = vld [vmem:[#allocation2 + $0x5d0] sm:$0xff] }
 0x2e9   :  { %935 = vmatprep.subr.bf16.mxu0 %v706_v27  ;;  %1107 = vmatprep.subr.bf16.mxu1 %v708_v25  ;;  %v754_v27 = vld [vmem:[#allocation2 + $0x5e8] sm:$0xff]  ;;  %v756_v25 = vld [vmem:[#allocation2 + $0x5f8] sm:$0xff] }
 0x2ec   :  { %936 = vmatpush1.bf16.msra.mxu0 %v705_v31  ;;  %1108 = vmatpush1.bf16.msra.mxu1 %v707_v11  ;;  %v753_v31 = vld [vmem:[#allocation2 + $0x5e0] sm:$0xff]  ;;  %v755_v11 = vld [vmem:[#allocation2 + $0x5f0] sm:$0xff] }
 0x2ed   :  { %937 = vmatprep.subr.bf16.mxu0 %v710_v20  ;;  %1109 = vmatprep.subr.bf16.mxu1 %v712_v23  ;;  %v758_v20 = vld [vmem:[#allocation2 + $0x608] sm:$0xff]  ;;  %v760_v23 = vld [vmem:[#allocation2 + $0x618] sm:$0xff] }
 0x2f0   :  { %938 = vmatpush1.bf16.msra.mxu0 %v709_v24  ;;  %1110 = vmatpush1.bf16.msra.mxu1 %v711_v37  ;;  %v561_v24 = vpack.c.bf16 %v549_v29, %v541_v1  ;;  %v757_v37 = vld [vmem:[#allocation2 + $0x600] sm:$0xff]  ;;  %v763_v1 = vld [vmem:[#allocation2 + $0x630] sm:$0xff]  ;;  %v768_v29 = vld [vmem:[#allocation2 + $0x658] sm:$0xff] }
 0x2f1   :  { %939 = vmatprep.subr.bf16.mxu0 %v714_v38  ;;  %1111 = vmatprep.subr.bf16.mxu1 %v716_v39  ;;  %v759_v38 = vld [vmem:[#allocation2 + $0x610] sm:$0xff]  ;;  %v762_v39 = vld [vmem:[#allocation2 + $0x628] sm:$0xff] }
 0x2f4   :  { %940 = vmatpush1.bf16.msra.mxu0 %v713_v40  ;;  %1112 = vmatpush1.bf16.msra.mxu1 %v715_v41  ;;  %v764_v40 = vld [vmem:[#allocation2 + $0x638] sm:$0xff]  ;;  %v564_v41 = vpack.c.bf16 %v552_v34, %v544_v26  ;;  %v769_v34 = vld [vmem:[#allocation2 + $0x660] sm:$0xff] }
 0x2f5   :  { %941 = vmatprep.subr.bf16.mxu0 %v718_v42  ;;  %1113 = vmatprep.subr.bf16.mxu1 %v720_v45  ;;  %v767_v42 = vld [vmem:[#allocation2 + $0x650] sm:$0xff]  ;;  %v772_v26 = vld [vmem:[#allocation2 + $0x678] sm:$0xff] }
 0x2f6   :  { %v771_v45 = vld [vmem:[#allocation2 + $0x670] sm:$0xff] }
 0x2f8   :  { %942 = vmatpush1.bf16.msra.mxu0 %v717_v46  ;;  %1114 = vmatpush1.bf16.msra.mxu1 %v719_v47  ;;  %v774_v46 = vld [vmem:[#allocation2 + $0x688] sm:$0xff]  ;;  %v776_v47 = vld [vmem:[#allocation2 + $0x698] sm:$0xff] }
 0x2f9   :  { %943 = vmatprep.subr.bf16.mxu0 %v722_v43  ;;  %1115 = vmatprep.subr.bf16.mxu1 %v724_v51  ;;  %v773_v43 = vld [vmem:[#allocation2 + $0x680] sm:$0xff]  ;;  %v775_v51 = vld [vmem:[#allocation2 + $0x690] sm:$0xff] }
 0x2fc   :  { %944 = vmatpush1.bf16.msra.mxu0 %v721_v53  ;;  %1116 = vmatpush1.bf16.msra.mxu1 %v723_v61  ;;  %v778_v53 = vld [vmem:[#allocation2 + $0x6a8] sm:$0xff]  ;;  %v780_v61 = vld [vmem:[#allocation2 + $0x6b8] sm:$0xff] }
 0x2fd   :  { %945 = vmatprep.subr.bf16.mxu0 %v726_v48  ;;  %1117 = vmatprep.subr.bf16.mxu1 %v728_v49  ;;  %v777_v48 = vld [vmem:[#allocation2 + $0x6a0] sm:$0xff]  ;;  %v779_v49 = vld [vmem:[#allocation2 + $0x6b0] sm:$0xff] }
 0x300   :  { %946 = vmatpush1.bf16.msra.mxu0 %v725_v60  ;;  %1118 = vmatpush1.bf16.msra.mxu1 %v727_v58  ;;  %v782_v60 = vld [vmem:[#allocation2 + $0x6c8] sm:$0xff]  ;;  %v784_v58 = vld [vmem:[#allocation2 + $0x6d8] sm:$0xff] }
 0x301   :  { %947 = vmatprep.subr.bf16.mxu0 %v730_v0  ;;  %1119 = vmatprep.subr.bf16.mxu1 %v732_v50  ;;  %v781_v0 = vld [vmem:[#allocation2 + $0x6c0] sm:$0xff]  ;;  %v783_v50 = vld [vmem:[#allocation2 + $0x6d0] sm:$0xff] }
 0x304   :  { %948 = vmatpush1.bf16.msra.mxu0 %v729_v55  ;;  %1120 = vmatpush1.bf16.msra.mxu1 %v731_v56  ;;  %v786_v55 = vld [vmem:[#allocation2 + $0x6e8] sm:$0xff]  ;;  %v788_v56 = vld [vmem:[#allocation2 + $0x6f8] sm:$0xff] }
 0x305   :  { %949 = vmatprep.subr.bf16.mxu0 %v734_v57  ;;  %1121 = vmatprep.subr.bf16.mxu1 %v736_v59  ;;  %v785_v57 = vld [vmem:[#allocation2 + $0x6e0] sm:$0xff]  ;;  %v787_v59 = vld [vmem:[#allocation2 + $0x6f0] sm:$0xff] }
 0x308   :  { %950 = vmatpush1.bf16.msra.mxu0 %v733_v63  ;;  %1122 = vmatpush1.bf16.msra.mxu1 %v735_v3  ;;  %v790_v63 = vld [vmem:[#allocation2 + $0x708] sm:$0xff]  ;;  %v792_v3 = vld [vmem:[#allocation2 + $0x718] sm:$0xff] }
 0x309   :  { %951 = vmatprep.subr.bf16.mxu0 %v738_v4  ;;  %1123 = vmatprep.subr.bf16.mxu1 %v740_v5  ;;  %v789_v4 = vld [vmem:[#allocation2 + $0x700] sm:$0xff]  ;;  %v791_v5 = vld [vmem:[#allocation2 + $0x710] sm:$0xff] }
 0x30c   :  { %952 = vmatpush1.bf16.msra.mxu0 %v737_v6  ;;  %1124 = vmatpush1.bf16.msra.mxu1 %v739_v8  ;;  %v794_v6 = vld [vmem:[#allocation2 + $0x728] sm:$0xff]  ;;  %v796_v8 = vld [vmem:[#allocation2 + $0x738] sm:$0xff] }
 0x30d   :  { %953 = vmatprep.subr.bf16.mxu0 %v742_v9  ;;  %1125 = vmatprep.subr.bf16.mxu1 %v744_v10  ;;  %v793_v9 = vld [vmem:[#allocation2 + $0x720] sm:$0xff]  ;;  %v795_v10 = vld [vmem:[#allocation2 + $0x730] sm:$0xff] }
 0x310   :  { %954 = vmatpush1.bf16.msra.mxu0 %v741_v12  ;;  %1126 = vmatpush1.bf16.msra.mxu1 %v743_v13  ;;  %v798_v12 = vld [vmem:[#allocation2 + $0x748] sm:$0xff]  ;;  %v800_v13 = vld [vmem:[#allocation2 + $0x758] sm:$0xff] }
 0x311   :  { %955 = vmatprep.subr.bf16.mxu0 %v746_v14  ;;  %1127 = vmatprep.subr.bf16.mxu1 %v748_v17  ;;  %v797_v14 = vld [vmem:[#allocation2 + $0x740] sm:$0xff]  ;;  %v799_v17 = vld [vmem:[#allocation2 + $0x750] sm:$0xff] }
 0x314   :  { %956 = vmatpush1.bf16.msra.mxu0 %v745_v44  ;;  %1128 = vmatpush1.bf16.msra.mxu1 %v747_v52  ;;  %v802_v44 = vld [vmem:[#allocation2 + $0x768] sm:$0xff]  ;;  %v804_v52 = vld [vmem:[#allocation2 + $0x778] sm:$0xff] }
 0x315   :  { %957 = vmatprep.subr.bf16.mxu0 %v750_v54  ;;  %1129 = vmatprep.subr.bf16.mxu1 %v752_v62  ;;  %v801_v54 = vld [vmem:[#allocation2 + $0x760] sm:$0xff]  ;;  %v803_v62 = vld [vmem:[#allocation2 + $0x770] sm:$0xff] }
 0x318   :  { %958 = vmatpush1.bf16.msra.mxu0 %v749_v19  ;;  %1130 = vmatpush1.bf16.msra.mxu1 %v751_v18  ;;  %v806_v19 = vld [vmem:[#allocation2 + $0x788] sm:$0xff]  ;;  %v808_v18 = vld [vmem:[#allocation2 + $0x798] sm:$0xff] }
 0x319   :  { %959 = vmatprep.subr.bf16.mxu0 %v754_v27  ;;  %1131 = vmatprep.subr.bf16.mxu1 %v756_v25  ;;  %v805_v27 = vld [vmem:[#allocation2 + $0x780] sm:$0xff]  ;;  %v807_v25 = vld [vmem:[#allocation2 + $0x790] sm:$0xff] }
 0x31c   :  { %960 = vmatpush1.bf16.msra.mxu0 %v753_v31  ;;  %1132 = vmatpush1.bf16.msra.mxu1 %v755_v11  ;;  %v810_v31 = vld [vmem:[#allocation2 + $0x7a8] sm:$0xff]  ;;  %v812_v11 = vld [vmem:[#allocation2 + $0x7b8] sm:$0xff] }
 0x31d   :  { %972 = vmatprep.subr.bf16.mxu0 %v758_v20  ;;  %1144 = vmatprep.subr.bf16.mxu1 %v760_v23  ;;  %v809_v20 = vld [vmem:[#allocation2 + $0x7a0] sm:$0xff]  ;;  %v811_v23 = vld [vmem:[#allocation2 + $0x7b0] sm:$0xff] }
 0x31f   :  { %962 = vmatmul.mubr.bf16.vlgmr.msra.gmra.mrb[8].mxu0 %v561_v24  ;;  %1134 = vmatmul.mubr.bf16.vlgmr.msra.gmra.mrb[8].mxu1 %v561_v24  ;;  %v814_v24 = vld [vmem:[#allocation2 + $0x7c8] sm:$0xff] }
 0x320   :  { %973 = vmatpush1.bf16.msra.mxu0 %v757_v37  ;;  %1145 = vmatpush1.bf16.msra.mxu1 %v759_v38  ;;  %v816_v37 = vld [vmem:[#allocation2 + $0x7d8] sm:$0xff]  ;;  %v813_v38 = vld [vmem:[#allocation2 + $0x7c0] sm:$0xff] }
 0x321   :  { %974 = vmatprep.subr.bf16.mxu0 %v762_v39  ;;  %1146 = vmatprep.subr.bf16.mxu1 %v764_v40  ;;  %v815_v39 = vld [vmem:[#allocation2 + $0x7d0] sm:$0xff]  ;;  %v818_v40 = vld [vmem:[#allocation2 + $0x7e8] sm:$0xff] }
 0x322   :  { %1004 = vmatprep.mubr.bf16.mxu0 %v564_v41  ;;  %1176 = vmatprep.mubr.bf16.mxu1 %v564_v41  ;;  %v820_v41 = vld [vmem:[#allocation2 + $0x7f8] sm:$0xff] }
 0x324   :  { %975 = vmatpush1.bf16.msra.mxu0 %v761_v15  ;;  %1147 = vmatpush1.bf16.msra.mxu1 %v763_v1  ;;  %v817_v15 = vld [vmem:[#allocation2 + $0x7e0] sm:$0xff]  ;;  %v819_v1 = vld [vmem:[#allocation2 + $0x7f0] sm:$0xff] }
 0x325   :  { %976 = vmatprep.subr.bf16.mxu0 %v766_v21  ;;  %1148 = vmatprep.subr.bf16.mxu1 %v768_v29  ;;  %v563_v21 = vpack.c.bf16 %v551_v30, %v543_v2  ;;  %v821_v29 = vld [vmem:[%s1711_s4] sm:$0xf]  ;;  %s1494_s4 = smov [#allocation10]  }
 0x326   :  { %v830_v16 = vrot.slane %v821_v29, %v1603_v35  ;;  %v838_v2 = vrot.slane %v821_v29, %v1605_v36 }
 0x328   :  { %977 = vmatpush1.bf16.msra.mxu0 %v765_v7  ;;  %1149 = vmatpush1.bf16.msra.mxu1 %v767_v42  ;;  %v826_v7 = vrot.slane %v821_v29, %v1596_v32  ;;  %v834_v42 = vrot.slane %v821_v29, %v1598_v33 }
 0x329   :  { %978 = vmatprep.subr.bf16.mxu0 %v770_v28  ;;  %1150 = vmatprep.subr.bf16.mxu1 %v772_v26  ;;  %v1195_v28 = vld [vmem:[%s1712_s5] sm:$0xf]  ;;  %s1291_s5 = sshll.u32 %s1494_s4, 4  ;;  %s1292_s5 = int_to_ptr.vmem [resolvable:$true] %s1291_s5 }
 0x32a   :  { %s1450_s21 = scalar_lea.vmem %s1292_s5, 16  ;;  %s1454_s22 = scalar_lea.vmem %s1292_s5, 32 }
 0x32b   :  { %p1451_p2 = scmp.ne.s32.totalorder %s1292_s5, %s1450_s21  ;;  %p1455_p3 = scmp.lt.s32.totalorder %s1292_s5, %s1292_s5 }
 0x32c   :  { %979 = vmatpush1.bf16.msra.mxu0 %v769_v34  ;;  %1151 = vmatpush1.bf16.msra.mxu1 %v771_v45  ;;  %v1200_v34 = vrot.slane %v1195_v28, %v1596_v32  ;;  %p1456_p4 = scmp.lt.s32.totalorder %s1454_s22, %s1450_s21 }
 0x32d   :  { %980 = vmatprep.subr.bf16.mxu0 %v774_v46  ;;  %1152 = vmatprep.subr.bf16.mxu1 %v776_v47 }
 0x32e   :  { %p1457_p5 = por %p1456_p4, %p1455_p3 }
 0x330   :  { %981 = vmatpush1.bf16.msra.mxu0 %v773_v43  ;;  %1153 = vmatpush1.bf16.msra.mxu1 %v775_v51  ;;  %v1204_v51 = vrot.slane %v1195_v28, %v1603_v35  ;;  %p1458_p6 = pnand %p1457_p5, %p1451_p2 }
 0x331   :  { %982 = vmatprep.subr.bf16.mxu0 %v778_v53  ;;  %1154 = vmatprep.subr.bf16.mxu1 %v780_v61 }
 0x334   :  { %983 = vmatpush1.bf16.msra.mxu0 %v777_v48  ;;  %1155 = vmatpush1.bf16.msra.mxu1 %v779_v49 }
 0x335   :  { %984 = vmatprep.subr.bf16.mxu0 %v782_v60  ;;  %1156 = vmatprep.subr.bf16.mxu1 %v784_v58  ;;  %v1208_v60 = vrot.slane %v1195_v28, %v1598_v33 }
 0x338   :  { %985 = vmatpush1.bf16.msra.mxu0 %v781_v0  ;;  %1157 = vmatpush1.bf16.msra.mxu1 %v783_v50 }
 0x339   :  { %986 = vmatprep.subr.bf16.mxu0 %v786_v55  ;;  %1158 = vmatprep.subr.bf16.mxu1 %v788_v56 }
 0x33c   :  { %987 = vmatpush1.bf16.msra.mxu0 %v785_v57  ;;  %1159 = vmatpush1.bf16.msra.mxu1 %v787_v59 }
 0x33d   :  { %988 = vmatprep.subr.bf16.mxu0 %v790_v63  ;;  %1160 = vmatprep.subr.bf16.mxu1 %v792_v3 }
 0x340   :  { %989 = vmatpush1.bf16.msra.mxu0 %v789_v4  ;;  %1161 = vmatpush1.bf16.msra.mxu1 %v791_v5  ;;  %v1212_v4 = vrot.slane %v1195_v28, %v1605_v36  ;;  %v1345_v36 = vld [vmem:[#allocation4] ss:$0 sm:$0xff] }
 0x341   :  { %990 = vmatprep.subr.bf16.mxu0 %v794_v6  ;;  %1162 = vmatprep.subr.bf16.mxu1 %v796_v8 }
 0x344   :  { %991 = vmatpush1.bf16.msra.mxu0 %v793_v9  ;;  %1163 = vmatpush1.bf16.msra.mxu1 %v795_v10 }
 0x345   :  { %992 = vmatprep.subr.bf16.mxu0 %v798_v12  ;;  %1164 = vmatprep.subr.bf16.mxu1 %v800_v13 }
 0x348   :  { %993 = vmatpush1.bf16.msra.mxu0 %v797_v14  ;;  %1165 = vmatpush1.bf16.msra.mxu1 %v799_v17 }
 0x349   :  { %994 = vmatprep.subr.bf16.mxu0 %v802_v44  ;;  %1166 = vmatprep.subr.bf16.mxu1 %v804_v52 }
 0x34c   :  { %995 = vmatpush1.bf16.msra.mxu0 %v801_v54  ;;  %1167 = vmatpush1.bf16.msra.mxu1 %v803_v62 }
 0x34d   :  { %996 = vmatprep.subr.bf16.mxu0 %v806_v19  ;;  %1168 = vmatprep.subr.bf16.mxu1 %v808_v18 }
 0x350   :  { %997 = vmatpush1.bf16.msra.mxu0 %v805_v27  ;;  %1169 = vmatpush1.bf16.msra.mxu1 %v807_v25 }
 0x351   :  { %998 = vmatprep.subr.bf16.mxu0 %v810_v31  ;;  %1170 = vmatprep.subr.bf16.mxu1 %v812_v11 }
 0x354   :  { %999 = vmatpush1.bf16.msra.mxu0 %v809_v20  ;;  %1171 = vmatpush1.bf16.msra.mxu1 %v811_v23 }
 0x355   :  { %1000 = vmatprep.subr.bf16.mxu0 %v814_v24  ;;  %1172 = vmatprep.subr.bf16.mxu1 %v816_v37 }
 0x358   :  { %1001 = vmatpush1.bf16.msra.mxu0 %v813_v38  ;;  %1173 = vmatpush1.bf16.msra.mxu1 %v815_v39 }
 0x359   :  { %1002 = vmatprep.subr.bf16.mxu0 %v818_v40  ;;  %1174 = vmatprep.subr.bf16.mxu1 %v820_v41 }
 0x35c   :  { %1003 = vmatpush1.bf16.msra.mxu0 %v817_v15  ;;  %1175 = vmatpush1.bf16.msra.mxu1 %v819_v1 }
 0x35f   :  { %1005 = vmatmul.mubr.bf16.vlgmr.msra.gmra.mrb[8].mxu0 %v563_v21  ;;  %1177 = vmatmul.mubr.bf16.vlgmr.msra.gmra.mrb[8].mxu1 %v563_v21 }
 0x432   :  { %v1006_v22 = vpop.f32.mrb[8].mxu0  ;;  %v1178_v30 = vpop.f32.mrb[8].mxu1 }
 0x433   :  { %v1347_v26 = vadd.f32 %v1006_v22, %v826_v7  ;;  %v1351_v45 = vadd.f32 %v1178_v30, %v834_v42  ;;  %v1008_v46 = vpop.f32.mrb[9].mxu0  ;;  %v1180_v47 = vpop.f32.mrb[9].mxu1 }
 0x434   :  { %v1348_v43 = vadd.f32 %v1008_v46, %v830_v16  ;;  %v1352_v53 = vadd.f32 %v1180_v47, %v838_v2  ;;  %v1010_v61 = vpop.f32.mrb[10].mxu0  ;;  %v1182_v48 = vpop.f32.mrb[10].mxu1 }
 0x435   :  { %v1187_v49 = vmax.f32 %v1347_v26, 0.0  ;;  %v1349_v58 = vadd.f32 %v1010_v61, %v826_v7  ;;  %v1353_v0 = vadd.f32 %v1182_v48, %v834_v42  ;;  %v1012_v50 = vpop.f32.mrb[11].mxu0  ;;  %v1184_v55 = vpop.f32.mrb[11].mxu1  ;;  %v1189_v56 = vmax.f32 %v1351_v45, 0.0 }
 0x436   :  { %v1188_v57 = vmax.f32 %v1348_v43, 0.0  ;;  %v1350_v59 = vadd.f32 %v1012_v50, %v830_v16  ;;  %v1354_v32 = vadd.f32 %v1184_v55, %v838_v2  ;;  %v1190_v35 = vmax.f32 %v1352_v53, 0.0 }
 0x437   :  { %v1217_v63 = vmul.f32 %v1200_v34, %v1187_v49  ;;  %v1191_v3 = vmax.f32 %v1349_v58, 0.0  ;;  %v1193_v6 = vmax.f32 %v1353_v0, 0.0  ;;  %v1219_v10 = vmul.f32 %v1208_v60, %v1189_v56 }
 0x438   :  { %v1218_v5 = vmul.f32 %v1204_v51, %v1188_v57  ;;  %v1192_v8 = vmax.f32 %v1350_v59, 0.0  ;;  %v1194_v33 = vmax.f32 %v1354_v32, 0.0  ;;  %v1220_v44 = vmul.f32 %v1212_v4, %v1190_v35 }
 0x439   :  { %v1221_v9 = vmul.f32 %v1200_v34, %v1191_v3  ;;  %v1223_v14 = vmul.f32 %v1208_v60, %v1193_v6 }
 0x43a   :  { %v1222_v12 = vmul.f32 %v1204_v51, %v1192_v8  ;;  %v1225_v13 = vadd.f32 %v1218_v5, %v1217_v63  ;;  %v1224_v54 = vmul.f32 %v1212_v4, %v1194_v33 }
 0x43c   :  { %v1230_v17 = vadd.f32 %v1222_v12, %v1221_v9  ;;  %v1226_v52 = vadd.f32 %v1225_v13, %v1219_v10 }
 0x43e   :  { %v1227_v62 = vadd.f32 %v1226_v52, %v1220_v44  ;;  %v1231_v19 = vadd.f32 %v1230_v17, %v1223_v14 }
 0x440   :  { %1228 = vadd.xlane.f32.xlu0 %v1227_v62  ;;  %v1232_v18 = vadd.f32 %v1231_v19, %v1224_v54 }
 0x444   :  { %1233 = vadd.xlane.f32.xlu0 %v1232_v18 }
 0x4cd   :  { %v1229_v27 = vpop.xlane.xlu0 %1228 }
 0x4ce   :  { %v1242_v25 = vadd.f32 %v1345_v36, %v1229_v27 }
 0x4d0   :  { %v1251_v31 = vmul.f32 -1.0, %v1242_v25 }
 0x4d1   :  { %v1234_v11 = vpop.xlane.xlu0 %1233 }
 0x4d2   :  { %v1255_v20 = vand.u32 2147483647, %v1251_v31  ;;  %v1243_v23 = vadd.f32 %v1345_v36, %v1234_v11  ;;  %v1253_v7 = vmax.f32 %v1251_v31, 0.0 }
 0x4d4   :  { %v1257_v24 = vsub.f32 0.0, %v1255_v20  ;;  %v1256_v37 = vand.u32 2147483647, %v1243_v23  ;;  %v1254_v2 = vmax.f32 %v1243_v23, 0.0 }
 0x4d6   :  { %v1259_v38 = vmul.f32 1.442695, %v1257_v24  ;;  %v1258_v39 = vsub.f32 0.0, %v1256_v37 }
 0x4d8   :  { %1398 = vpow2.f32 %v1259_v38  ;;  %v1261_v40 = vmul.f32 1.442695, %v1258_v39 }
 0x4da   :  { %1400 = vpow2.f32 %v1261_v40 }
 0x4e2   :  { %v1399_v41 = vpop.eup %1398 }
 0x4e3   :  { %v1263_v15 = vadd.f32 1.0, %v1399_v41 }
 0x4e4   :  { %v1401_v1 = vpop.eup %1400 }
 0x4e5   :  { %1402 = vlog2.f32 %v1263_v15  ;;  %v1264_v21 = vadd.f32 1.0, %v1401_v1 }
 0x4e7   :  { %1404 = vlog2.f32 %v1264_v21 }
 0x4ef   :  { %v1403_v29 = vpop.eup %1402 }
 0x4f0   :  { %v1266_v42 = vmul.f32 0.6931472, %v1403_v29 }
 0x4f1   :  { %v1405_v28 = vpop.eup %1404 }
 0x4f2   :  { %v1269_v16 = vadd.f32 %v1266_v42, %v1253_v7  ;;  %v1268_v22 = vmul.f32 0.6931472, %v1405_v28 }
 0x4f4   :  { %v1270_v30 = vadd.f32 %v1268_v22, %v1254_v2  ;;  %v1272_v26 = vsel %vm1271_vm3, %v1269_v16, 0.0 }
 0x4f6   :  { %v1273_v34 = vsel %vm1271_vm3, %v1270_v30, 0.0 }
 0x4f7   :  { %v1274_v45 = vadd.f32 %v1273_v34, %v1272_v26 }
 0x4f9   :  { %v1275_v46 = vrot.slane %v1274_v45, 4 }
 0x4fb   :  { %v1276_v47 = vadd.f32 %v1275_v46, %v1274_v45 }
 0x4fd   :  { %v1277_v43 = vrot.slane %v1276_v47, 2 }
 0x4ff   :  { %v1278_v51 = vadd.f32 %v1277_v43, %v1276_v47 }
 0x501   :  { %v1279_v53 = vrot.slane %v1278_v51, 1 }
 0x503   :  { %v1280_v61 = vadd.f32 %v1279_v53, %v1278_v51 }
 0x505   :  { %v1281_v48 = vsub.f32 0.0, %v1280_v61 }
 0x507   :  { %v1282_v49 = vmul.f32 0.125, %v1281_v48 }
 0x509   :  { %1284 = vst.msk [vmem:[#allocation10] sm:$0x1] %vm1283_vm4, %v1282_v49 }
 0x50a   :  { %1461 = shalt.err (!%p1458_p6)
}
 0x50b   :  { %s1462_s25 = scalar_lea.hbm %s1714_s7, 16 }
 0x50c   :  { %p1463_p7 = scmp.ne.s32.totalorder %s1714_s7, %s1462_s25  ;;  %p1466_p8 = scmp.lt.u32.totalorder %s1462_s25, %s1714_s7 }
 0x50e   :  { %p1468_p9 = pnand %p1466_p8, %p1463_p7 }
 0x510   :  { %1471 = shalt.err (!%p1468_p9)
}
 0x511   :  { %1294 = dma.vmem_to_hbm [thread:$0]  %s1292_s5, 16, %s1714_s7, [#allocation7]  }
 0x512   :  { %1478 = dma.done.wait [#allocation7], 16  }
 0x513   :  { %1479 = vsyncadd [#allocation7], 4294967280 }
 0x514   :  { %1298 = vsyncpa [#allocation6], 1 }
 0x515   :  { %1299 = vsyncpa [#allocation9], 1 }
 0x516   :  { %1300 = vsyncpa [#allocation7], 1 }
 0x517   :  { %1301 = vsyncmov [#allocation3] }
 0x51a   :  { %s1302_s8 = vpop.sfrf %1301 }
 0x51b   :  { %p1346_p10 = scmp.ne.s32.totalorder %s1302_s8, 0 }
 0x51d   :  { %1306 = shalt.err (%p1346_p10)  }

</bundles_post_ra>
